<compile_context>
chip_gen: v7x
topology: tpu7x:2x2x1
jax: 0.10.0
libtpu: 0.0.40
codegen_flags: <defaults>
</compile_context>

<pallas_src>
import math

import jax
import jax.numpy as jnp
from jax import lax
from jax.experimental import pallas as pl
from jax.experimental.pallas import tpu as pltpu  # noqa: F401  (TPU backend)

# ----- model hyper-parameters (small, consistent with the module) -----
B = 2            # batch
N = 8            # tokens
C = 32           # embedding dim
NUM_HEADS = 4
HEAD_DIM = C // NUM_HEADS          # 8
MLP_RATIO = 4.0
HIDDEN = int(C * MLP_RATIO)        # 128
SCALE = HEAD_DIM ** (-0.5)
LN_EPS = 1e-5
INV_SQRT2 = 1.0 / math.sqrt(2.0)

BN = B * N                         # 16 rows processed in one shot
BH = B * NUM_HEADS                 # 8  batch dim of the attention dots

# ----- packed-operand layout -----
# weight slab columns: [ wqkv (3C) | wproj (C) | w1 (HIDDEN) | w2^T (HIDDEN) ]
W_QKV0 = 0
W_PROJ0 = 3 * C                    # 96
W_FC10 = 4 * C                     # 128
W_FC2T0 = 4 * C + HIDDEN           # 256
W_COLS = 4 * C + 2 * HIDDEN        # 384 (lane-dense: 3 * 128)

# vector slab rows (8, 128)
R_G1, R_B1, R_BPROJ, R_G2, R_B2, R_BFC2, R_BFC1 = 0, 1, 2, 3, 4, 5, 6
VEC_ROWS = 8
VEC_W = 128

# advisory cost estimate
_FLOPS = (2 * BN * C * (3 * C)              # qkv
          + 2 * 2 * BH * N * N * HEAD_DIM   # q@k^T and p@v
          + 2 * BN * C * C                  # proj
          + 2 * 2 * BN * C * HIDDEN)        # fc1 + fc2
_TRANS = BH * N * N + BN * HIDDEN + 2 * BN + BH * N
_BYTES = 4 * (2 * BN * C + C * W_COLS + VEC_ROWS * VEC_W)


def _layernorm(x, gamma, beta):
    mu = jnp.mean(x, axis=-1, keepdims=True)
    var = jnp.mean((x - mu) * (x - mu), axis=-1, keepdims=True)
    return (x - mu) * lax.rsqrt(var + LN_EPS) * gamma + beta


def _gelu_exact(x):
    # matches torch.nn.GELU() (erf formulation)
    return 0.5 * x * (1.0 + lax.erf(x * INV_SQRT2))


def _split_heads(m2d):
    # (BN, C) -> (B*H, N, hd)
    m = m2d.reshape(B, N, NUM_HEADS, HEAD_DIM)
    m = jnp.transpose(m, (0, 2, 1, 3))
    return m.reshape(BH, N, HEAD_DIM)


def _merge_heads(m3d):
    # (B*H, N, hd) -> (BN, C)
    m = m3d.reshape(B, NUM_HEADS, N, HEAD_DIM)
    m = jnp.transpose(m, (0, 2, 1, 3))
    return m.reshape(BN, C)


def block_kernel(x_ref, w_ref, vec_ref, o_ref):
    x = x_ref[...].astype(jnp.float32)                       # (BN, C)

    # packed 1-row parameter vectors (kept 2-D to avoid 1-D layout surprises)
    g1 = vec_ref[R_G1:R_G1 + 1, :C]
    b1 = vec_ref[R_B1:R_B1 + 1, :C]
    bproj = vec_ref[R_BPROJ:R_BPROJ + 1, :C]
    g2 = vec_ref[R_G2:R_G2 + 1, :C]
    b2 = vec_ref[R_B2:R_B2 + 1, :C]
    bfc2 = vec_ref[R_BFC2:R_BFC2 + 1, :C]
    bfc1 = vec_ref[R_BFC1:R_BFC1 + 1, :HIDDEN]

    # ---------------- Attention branch ----------------
    xn = _layernorm(x, g1, b1)                                # (BN, C)
    qkv = jnp.dot(xn, w_ref[:, W_QKV0:W_QKV0 + 3 * C],
                  preferred_element_type=jnp.float32)         # (BN, 3C), qkv_bias=False

    q = _split_heads(qkv[:, 0:C])                             # (B*H, N, hd)
    k = _split_heads(qkv[:, C:2 * C])
    v = _split_heads(qkv[:, 2 * C:3 * C])

    # one batched dot for all (batch, head) pairs
    s = jnp.einsum('znd,zmd->znm', q, k,
                   preferred_element_type=jnp.float32) * SCALE  # (B*H, N, N)
    s_max = jnp.max(s, axis=-1, keepdims=True)
    e = jnp.exp(s - s_max)
    denom = jnp.sum(e, axis=-1, keepdims=True)
    inv = pl.reciprocal(denom, approx=True)                   # EUP
    inv = inv * (2.0 - denom * inv)                           # one Newton step
    p = e * inv

    ao = jnp.einsum('znm,zmd->znd', p, v,
                    preferred_element_type=jnp.float32)       # (B*H, N, hd)
    ao = _merge_heads(ao)                                     # (BN, C)

    ao = jnp.dot(ao, w_ref[:, W_PROJ0:W_PROJ0 + C],
                 preferred_element_type=jnp.float32) + bproj
    x = x + ao                                                # residual 1

    # ---------------- MLP branch ----------------
    xn2 = _layernorm(x, g2, b2)
    h1 = jnp.dot(xn2, w_ref[:, W_FC10:W_FC10 + HIDDEN],
                 preferred_element_type=jnp.float32) + bfc1   # (BN, HIDDEN)
    h1 = _gelu_exact(h1)
    # fc2 weight stored transposed in the slab: slice is (C, HIDDEN) == w2^T
    h2 = lax.dot_general(h1, w_ref[:, W_FC2T0:W_FC2T0 + HIDDEN],
                         (((1,), (1,)), ((), ())),
                         preferred_element_type=jnp.float32) + bfc2   # (BN, C)

    o_ref[...] = (x + h2).astype(o_ref.dtype)                 # residual 2


def pack_params(params):
    (g1, b1, wqkv, wproj, bproj, g2, b2, w1, bfc1, w2, bfc2) = params
    w_slab = jnp.concatenate(
        [wqkv, wproj, w1, w2.T], axis=1).astype(jnp.float32)  # (C, 384)

    def row(v):
        v = jnp.asarray(v, jnp.float32).reshape(-1)
        return jnp.pad(v, (0, VEC_W - v.shape[0]))

    vec_slab = jnp.stack(
        [row(g1), row(b1), row(bproj), row(g2), row(b2), row(bfc2), row(bfc1),
         jnp.zeros((VEC_W,), jnp.float32)], axis=0)           # (8, 128)
    return w_slab, vec_slab


def block_forward(x, params):
    w_slab, vec_slab = pack_params(params)
    x2d = x.reshape(BN, C)                                    # free wrapper reshape

    out2d = pl.pallas_call(
        block_kernel,
        out_shape=jax.ShapeDtypeStruct((BN, C), x.dtype),
        grid=(1,),                                            # single invocation
        in_specs=[
            pl.BlockSpec((BN, C), lambda i: (0, 0)),          # x slab
            pl.BlockSpec((C, W_COLS), lambda i: (0, 0)),      # packed weights
            pl.BlockSpec((VEC_ROWS, VEC_W), lambda i: (0, 0)),  # packed vectors
        ],
        out_specs=pl.BlockSpec((BN, C), lambda i: (0, 0)),
        cost_estimate=pl.CostEstimate(
            flops=_FLOPS, transcendentals=_TRANS, bytes_accessed=_BYTES),
    )(x2d, w_slab, vec_slab)
    return out2d.reshape(B, N, C)


def block_reference(x, params):
    """Plain-JAX reference of the same Block forward pass."""
    (g1, b1, wqkv, wproj, bproj, g2, b2, w1, bfc1, w2, bfc2) = params
    xf = x.astype(jnp.float32)

    xn = _layernorm(xf, g1, b1)
    qkv = jnp.einsum('bnc,cd->bnd', xn, wqkv)                 # (B, N, 3C)
    qkv = qkv.reshape(B, N, 3, NUM_HEADS, HEAD_DIM).transpose(2, 0, 3, 1, 4)
    q, k, v = qkv[0], qkv[1], qkv[2]                          # (B, H, N, hd)
    attn = jnp.einsum('bhnd,bhmd->bhnm', q, k) * SCALE
    attn = jax.nn.softmax(attn, axis=-1)
    ao = jnp.einsum('bhnm,bhmd->bhnd', attn, v)
    ao = ao.transpose(0, 2, 1, 3).reshape(B, N, C)
    ao = jnp.einsum('bnc,cd->bnd', ao, wproj) + bproj
    xf = xf + ao

    xn2 = _layernorm(xf, g2, b2)
    h1 = _gelu_exact(jnp.einsum('bnc,ch->bnh', xn2, w1) + bfc1)
    h2 = jnp.einsum('bnh,hc->bnc', h1, w2) + bfc2
    return (xf + h2).astype(x.dtype)


def init_params(key):
    ks = jax.random.split(key, 7)

    def lin(k, fan_in, fan_out):
        bound = 1.0 / math.sqrt(fan_in)
        return jax.random.uniform(k, (fan_in, fan_out), jnp.float32, -bound, bound)

    g1 = jnp.ones((C,), jnp.float32)
    b1 = jnp.zeros((C,), jnp.float32)
    g2 = jnp.ones((C,), jnp.float32)
    b2 = jnp.zeros((C,), jnp.float32)

    wqkv = lin(ks[0], C, 3 * C)                               # qkv_bias=False
    wproj = lin(ks[1], C, C)
    bproj = jax.random.uniform(ks[2], (C,), jnp.float32,
                               -1.0 / math.sqrt(C), 1.0 / math.sqrt(C))
    w1 = lin(ks[3], C, HIDDEN)
    bfc1 = jax.random.uniform(ks[4], (HIDDEN,), jnp.float32,
                              -1.0 / math.sqrt(C), 1.0 / math.sqrt(C))
    w2 = lin(ks[5], HIDDEN, C)
    bfc2 = jax.random.uniform(ks[6], (C,), jnp.float32,
                              -1.0 / math.sqrt(HIDDEN), 1.0 / math.sqrt(HIDDEN))
    return (g1, b1, wqkv, wproj, bproj, g2, b2, w1, bfc1, w2, bfc2)


if __name__ == "__main__":
    key = jax.random.PRNGKey(0)
    kx, kp = jax.random.split(key)
    x = jax.random.normal(kx, (B, N, C), jnp.float32)
    params = init_params(kp)

    out = block_forward(x, params)
    out = jax.block_until_ready(out)

    ref = block_reference(x, params)
    assert out.shape == (B, N, C)
    err = float(jnp.max(jnp.abs(out - ref)))
    assert jnp.allclose(out, ref, rtol=1e-4, atol=1e-4), f"max abs err {err}"

    print("KERNEL_OK")
</pallas_src>

<mosaic_0001>
module attributes {stable_mosaic.version = 11 : i64} {
  func.func @block_kernel(%arg0: i32, %arg1: memref<16x32xf32, #tpu.memory_space<vmem>>, %arg2: memref<32x384xf32, #tpu.memory_space<vmem>>, %arg3: memref<8x128xf32, #tpu.memory_space<vmem>>, %arg4: memref<16x32xf32, #tpu.memory_space<vmem>>) attributes {dimension_semantics = [#tpu.dimension_semantics<arbitrary>], iteration_bounds = array<i64: 1>, scalar_prefetch = 0 : i64, scratch_operands = 0 : i64, tpu.core_type = #tpu.core_type<tc>, window_params = [{pipeline_mode = #tpu.pipeline_mode<synchronous>, transform_indices = @transform_0, window_bounds = array<i64: 16, 32>}, {pipeline_mode = #tpu.pipeline_mode<synchronous>, transform_indices = @transform_1, window_bounds = array<i64: 32, 384>}, {pipeline_mode = #tpu.pipeline_mode<synchronous>, transform_indices = @transform_2, window_bounds = array<i64: 8, 128>}, {pipeline_mode = #tpu.pipeline_mode<synchronous>, transform_indices = @transform_3, window_bounds = array<i64: 16, 32>}]} {
    %c0 = arith.constant 0 : index
    %c0_0 = arith.constant 0 : index
    %0 = vector.load %arg1[%c0, %c0_0] : memref<16x32xf32, #tpu.memory_space<vmem>>, vector<16x32xf32>
    %c0_1 = arith.constant 0 : index
    %c0_2 = arith.constant 0 : index
    %1 = vector.load %arg3[%c0_1, %c0_2] : memref<8x128xf32, #tpu.memory_space<vmem>>, vector<1x32xf32>
    %c1 = arith.constant 1 : index
    %c0_3 = arith.constant 0 : index
    %2 = vector.load %arg3[%c1, %c0_3] : memref<8x128xf32, #tpu.memory_space<vmem>>, vector<1x32xf32>
    %c2 = arith.constant 2 : index
    %c0_4 = arith.constant 0 : index
    %3 = vector.load %arg3[%c2, %c0_4] : memref<8x128xf32, #tpu.memory_space<vmem>>, vector<1x32xf32>
    %c3 = arith.constant 3 : index
    %c0_5 = arith.constant 0 : index
    %4 = vector.load %arg3[%c3, %c0_5] : memref<8x128xf32, #tpu.memory_space<vmem>>, vector<1x32xf32>
    %c4 = arith.constant 4 : index
    %c0_6 = arith.constant 0 : index
    %5 = vector.load %arg3[%c4, %c0_6] : memref<8x128xf32, #tpu.memory_space<vmem>>, vector<1x32xf32>
    %c5 = arith.constant 5 : index
    %c0_7 = arith.constant 0 : index
    %6 = vector.load %arg3[%c5, %c0_7] : memref<8x128xf32, #tpu.memory_space<vmem>>, vector<1x32xf32>
    %c6 = arith.constant 6 : index
    %c0_8 = arith.constant 0 : index
    %7 = vector.load %arg3[%c6, %c0_8] : memref<8x128xf32, #tpu.memory_space<vmem>>, vector<1x128xf32>
    %cst = arith.constant dense<0.000000e+00> : vector<16xf32>
    %8 = vector.multi_reduction <add>, %0, %cst [1] : vector<16x32xf32> to vector<16xf32>
    %9 = vector.shape_cast %8 : vector<16xf32> to vector<16x1xf32>
    %cst_9 = arith.constant 3.200000e+01 : f32
    %10 = vector.broadcast %cst_9 : f32 to vector<16x1xf32>
    %11 = arith.divf %9, %10 : vector<16x1xf32>
    %12 = vector.broadcast %11 : vector<16x1xf32> to vector<16x32xf32>
    %13 = arith.subf %0, %12 : vector<16x32xf32>
    %14 = vector.broadcast %11 : vector<16x1xf32> to vector<16x32xf32>
    %15 = arith.subf %0, %14 : vector<16x32xf32>
    %16 = arith.mulf %13, %15 : vector<16x32xf32>
    %cst_10 = arith.constant dense<0.000000e+00> : vector<16xf32>
    %17 = vector.multi_reduction <add>, %16, %cst_10 [1] : vector<16x32xf32> to vector<16xf32>
    %18 = vector.shape_cast %17 : vector<16xf32> to vector<16x1xf32>
    %cst_11 = arith.constant 3.200000e+01 : f32
    %19 = vector.broadcast %cst_11 : f32 to vector<16x1xf32>
    %20 = arith.divf %18, %19 : vector<16x1xf32>
    %21 = vector.broadcast %11 : vector<16x1xf32> to vector<16x32xf32>
    %22 = arith.subf %0, %21 : vector<16x32xf32>
    %cst_12 = arith.constant 9.99999974E-6 : f32
    %23 = vector.broadcast %cst_12 : f32 to vector<16x1xf32>
    %24 = arith.addf %20, %23 : vector<16x1xf32>
    %25 = math.rsqrt %24 : vector<16x1xf32>
    %26 = vector.broadcast %25 : vector<16x1xf32> to vector<16x32xf32>
    %27 = arith.mulf %22, %26 : vector<16x32xf32>
    %28 = vector.broadcast %1 : vector<1x32xf32> to vector<16x32xf32>
    %29 = arith.mulf %27, %28 : vector<16x32xf32>
    %30 = vector.broadcast %2 : vector<1x32xf32> to vector<16x32xf32>
    %31 = arith.addf %29, %30 : vector<16x32xf32>
    %c0_13 = arith.constant 0 : index
    %c0_14 = arith.constant 0 : index
    %32 = vector.load %arg2[%c0_13, %c0_14] : memref<32x384xf32, #tpu.memory_space<vmem>>, vector<32x96xf32>
    %cst_15 = arith.constant dense<0.000000e+00> : vector<16x96xf32>
    %33 = tpu.matmul %31, %32, %cst_15 {dimension_numbers = #tpu.dot_dimension_numbers<[1], [0], [0], [1], [0, 0, 1, 1], [], []>} : vector<16x32xf32>, vector<32x96xf32>, vector<16x96xf32> -> vector<16x96xf32>
    %34 = vector.extract_strided_slice %33 {offsets = [0, 0], sizes = [16, 32], strides = [1, 1]} : vector<16x96xf32> to vector<16x32xf32>
    %35 = vector.shape_cast %34 : vector<16x32xf32> to vector<2x8x4x8xf32>
    %36 = tpu.transpose %35, [0, 2, 1, 3] : vector<2x8x4x8xf32> -> vector<2x4x8x8xf32>
    %37 = vector.shape_cast %36 : vector<2x4x8x8xf32> to vector<8x8x8xf32>
    %38 = vector.extract_strided_slice %33 {offsets = [0, 32], sizes = [16, 32], strides = [1, 1]} : vector<16x96xf32> to vector<16x32xf32>
    %39 = vector.shape_cast %38 : vector<16x32xf32> to vector<2x8x4x8xf32>
    %40 = tpu.transpose %39, [0, 2, 1, 3] : vector<2x8x4x8xf32> -> vector<2x4x8x8xf32>
    %41 = vector.shape_cast %40 : vector<2x4x8x8xf32> to vector<8x8x8xf32>
    %42 = vector.extract_strided_slice %33 {offsets = [0, 64], sizes = [16, 32], strides = [1, 1]} : vector<16x96xf32> to vector<16x32xf32>
    %43 = vector.shape_cast %42 : vector<16x32xf32> to vector<2x8x4x8xf32>
    %44 = tpu.transpose %43, [0, 2, 1, 3] : vector<2x8x4x8xf32> -> vector<2x4x8x8xf32>
    %45 = vector.shape_cast %44 : vector<2x4x8x8xf32> to vector<8x8x8xf32>
    "tpu.trace_start"() <{level = 10 : i32, message = "znd,zmd->znm"}> : () -> ()
    %cst_16 = arith.constant dense<0.000000e+00> : vector<8x8x8xf32>
    %46 = tpu.matmul %37, %41, %cst_16 {dimension_numbers = #tpu.dot_dimension_numbers<[2], [2], [1], [1], [0, 0, 0, 1, 1, 1], [0], [0]>} : vector<8x8x8xf32>, vector<8x8x8xf32>, vector<8x8x8xf32> -> vector<8x8x8xf32>
    "tpu.trace_stop"() : () -> ()
    %cst_17 = arith.constant 0.353553385 : f32
    %47 = vector.broadcast %cst_17 : f32 to vector<8x8x8xf32>
    %48 = arith.mulf %46, %47 : vector<8x8x8xf32>
    %cst_18 = arith.constant dense<0xFF800000> : vector<8x8xf32>
    %49 = vector.multi_reduction <maximumf>, %48, %cst_18 [2] : vector<8x8x8xf32> to vector<8x8xf32>
    %50 = vector.shape_cast %49 : vector<8x8xf32> to vector<8x8x1xf32>
    %51 = vector.broadcast %50 : vector<8x8x1xf32> to vector<8x8x8xf32>
    %52 = arith.subf %48, %51 : vector<8x8x8xf32>
    %53 = math.exp %52 : vector<8x8x8xf32>
    %cst_19 = arith.constant dense<0.000000e+00> : vector<8x8xf32>
    %54 = vector.multi_reduction <add>, %53, %cst_19 [2] : vector<8x8x8xf32> to vector<8x8xf32>
    %55 = vector.shape_cast %54 : vector<8x8xf32> to vector<8x8x1xf32>
    %56 = tpu.reciprocal %55 {approx = true} : vector<8x8x1xf32> -> vector<8x8x1xf32>
    %57 = arith.mulf %55, %56 : vector<8x8x1xf32>
    %cst_20 = arith.constant 2.000000e+00 : f32
    %58 = vector.broadcast %cst_20 : f32 to vector<8x8x1xf32>
    %59 = arith.subf %58, %57 : vector<8x8x1xf32>
    %60 = arith.mulf %56, %59 : vector<8x8x1xf32>
    %61 = vector.broadcast %60 : vector<8x8x1xf32> to vector<8x8x8xf32>
    %62 = arith.mulf %53, %61 : vector<8x8x8xf32>
    "tpu.trace_start"() <{level = 10 : i32, message = "znm,zmd->znd"}> : () -> ()
    %cst_21 = arith.constant dense<0.000000e+00> : vector<8x8x8xf32>
    %63 = tpu.matmul %62, %45, %cst_21 {dimension_numbers = #tpu.dot_dimension_numbers<[2], [1], [1], [2], [0, 0, 0, 1, 1, 2], [0], [0]>} : vector<8x8x8xf32>, vector<8x8x8xf32>, vector<8x8x8xf32> -> vector<8x8x8xf32>
    "tpu.trace_stop"() : () -> ()
    %64 = vector.shape_cast %63 : vector<8x8x8xf32> to vector<2x4x8x8xf32>
    %65 = tpu.transpose %64, [0, 2, 1, 3] : vector<2x4x8x8xf32> -> vector<2x8x4x8xf32>
    %66 = vector.shape_cast %65 : vector<2x8x4x8xf32> to vector<16x32xf32>
    %c0_22 = arith.constant 0 : index
    %c96 = arith.constant 96 : index
    %67 = vector.load %arg2[%c0_22, %c96] : memref<32x384xf32, #tpu.memory_space<vmem>>, vector<32x32xf32>
    %cst_23 = arith.constant dense<0.000000e+00> : vector<16x32xf32>
    %68 = tpu.matmul %66, %67, %cst_23 {dimension_numbers = #tpu.dot_dimension_numbers<[1], [0], [0], [1], [0, 0, 1, 1], [], []>} : vector<16x32xf32>, vector<32x32xf32>, vector<16x32xf32> -> vector<16x32xf32>
    %69 = vector.broadcast %3 : vector<1x32xf32> to vector<16x32xf32>
    %70 = arith.addf %68, %69 : vector<16x32xf32>
    %71 = arith.addf %0, %70 : vector<16x32xf32>
    %cst_24 = arith.constant dense<0.000000e+00> : vector<16xf32>
    %72 = vector.multi_reduction <add>, %71, %cst_24 [1] : vector<16x32xf32> to vector<16xf32>
    %73 = vector.shape_cast %72 : vector<16xf32> to vector<16x1xf32>
    %cst_25 = arith.constant 3.200000e+01 : f32
    %74 = vector.broadcast %cst_25 : f32 to vector<16x1xf32>
    %75 = arith.divf %73, %74 : vector<16x1xf32>
    %76 = vector.broadcast %75 : vector<16x1xf32> to vector<16x32xf32>
    %77 = arith.subf %71, %76 : vector<16x32xf32>
    %78 = vector.broadcast %75 : vector<16x1xf32> to vector<16x32xf32>
    %79 = arith.subf %71, %78 : vector<16x32xf32>
    %80 = arith.mulf %77, %79 : vector<16x32xf32>
    %cst_26 = arith.constant dense<0.000000e+00> : vector<16xf32>
    %81 = vector.multi_reduction <add>, %80, %cst_26 [1] : vector<16x32xf32> to vector<16xf32>
    %82 = vector.shape_cast %81 : vector<16xf32> to vector<16x1xf32>
    %cst_27 = arith.constant 3.200000e+01 : f32
    %83 = vector.broadcast %cst_27 : f32 to vector<16x1xf32>
    %84 = arith.divf %82, %83 : vector<16x1xf32>
    %85 = vector.broadcast %75 : vector<16x1xf32> to vector<16x32xf32>
    %86 = arith.subf %71, %85 : vector<16x32xf32>
    %cst_28 = arith.constant 9.99999974E-6 : f32
    %87 = vector.broadcast %cst_28 : f32 to vector<16x1xf32>
    %88 = arith.addf %84, %87 : vector<16x1xf32>
    %89 = math.rsqrt %88 : vector<16x1xf32>
    %90 = vector.broadcast %89 : vector<16x1xf32> to vector<16x32xf32>
    %91 = arith.mulf %86, %90 : vector<16x32xf32>
    %92 = vector.broadcast %4 : vector<1x32xf32> to vector<16x32xf32>
    %93 = arith.mulf %91, %92 : vector<16x32xf32>
    %94 = vector.broadcast %5 : vector<1x32xf32> to vector<16x32xf32>
    %95 = arith.addf %93, %94 : vector<16x32xf32>
    %c0_29 = arith.constant 0 : index
    %c128 = arith.constant 128 : index
    %96 = vector.load %arg2[%c0_29, %c128] : memref<32x384xf32, #tpu.memory_space<vmem>>, vector<32x128xf32>
    %cst_30 = arith.constant dense<0.000000e+00> : vector<16x128xf32>
    %97 = tpu.matmul %95, %96, %cst_30 {dimension_numbers = #tpu.dot_dimension_numbers<[1], [0], [0], [1], [0, 0, 1, 1], [], []>} : vector<16x32xf32>, vector<32x128xf32>, vector<16x128xf32> -> vector<16x128xf32>
    %98 = vector.broadcast %7 : vector<1x128xf32> to vector<16x128xf32>
    %99 = arith.addf %97, %98 : vector<16x128xf32>
    %cst_31 = arith.constant 5.000000e-01 : f32
    %100 = vector.broadcast %cst_31 : f32 to vector<16x128xf32>
    %101 = arith.mulf %100, %99 : vector<16x128xf32>
    %cst_32 = arith.constant 0.707106769 : f32
    %102 = vector.broadcast %cst_32 : f32 to vector<16x128xf32>
    %103 = arith.mulf %99, %102 : vector<16x128xf32>
    %104 = math.erf %103 : vector<16x128xf32>
    %cst_33 = arith.constant 1.000000e+00 : f32
    %105 = vector.broadcast %cst_33 : f32 to vector<16x128xf32>
    %106 = arith.addf %105, %104 : vector<16x128xf32>
    %107 = arith.mulf %101, %106 : vector<16x128xf32>
    %c0_34 = arith.constant 0 : index
    %c256 = arith.constant 256 : index
    %108 = vector.load %arg2[%c0_34, %c256] : memref<32x384xf32, #tpu.memory_space<vmem>>, vector<32x128xf32>
    %cst_35 = arith.constant dense<0.000000e+00> : vector<16x32xf32>
    %109 = tpu.matmul %107, %108, %cst_35 {dimension_numbers = #tpu.dot_dimension_numbers<[1], [1], [0], [0], [0, 0, 1, 0], [], []>} : vector<16x128xf32>, vector<32x128xf32>, vector<16x32xf32> -> vector<16x32xf32>
    %110 = vector.broadcast %6 : vector<1x32xf32> to vector<16x32xf32>
    %111 = arith.addf %109, %110 : vector<16x32xf32>
    %112 = arith.addf %71, %111 : vector<16x32xf32>
    %c0_36 = arith.constant 0 : index
    %c0_37 = arith.constant 0 : index
    %113 = vector.load %arg4[%c0_36, %c0_37] : memref<16x32xf32, #tpu.memory_space<vmem>>, vector<16x32xf32>
    tpu.vector_store %arg4[%c0_36, %c0_37], %112 {strides = array<i32>} : memref<16x32xf32, #tpu.memory_space<vmem>>, vector<16x32xf32>,
    return
  }
  func.func @transform_0(%arg0: i32) -> (i32, i32) {
    %c0_i32 = arith.constant 0 : i32
    %c0_i32_0 = arith.constant 0 : i32
    %c0_i32_1 = arith.constant 0 : i32
    return %c0_i32, %c0_i32_0 : i32, i32
  }
  func.func @transform_1(%arg0: i32) -> (i32, i32) {
    %c0_i32 = arith.constant 0 : i32
    %c0_i32_0 = arith.constant 0 : i32
    %c0_i32_1 = arith.constant 0 : i32
    return %c0_i32, %c0_i32_0 : i32, i32
  }
  func.func @transform_2(%arg0: i32) -> (i32, i32) {
    %c0_i32 = arith.constant 0 : i32
    %c0_i32_0 = arith.constant 0 : i32
    %c0_i32_1 = arith.constant 0 : i32
    return %c0_i32, %c0_i32_0 : i32, i32
  }
  func.func @transform_3(%arg0: i32) -> (i32, i32) {
    %c0_i32 = arith.constant 0 : i32
    %c0_i32_0 = arith.constant 0 : i32
    %c0_i32_1 = arith.constant 0 : i32
    return %c0_i32, %c0_i32_0 : i32, i32
  }
}

</mosaic_0001>

<bundles_post_ra>
// kernel: tpu_custom_call.1
= control target key start
LH: loop header
LB: loop body
LE: loop exit
PB: predicated region body
PF: predicated region fallthrough
CT: control target
= control target key end

     0   :  { %8 = vsyncpa [#allocation3], 0  ;;  %s3957_s0 = inlined_call_operand.hbm [shape: f32[16,32], index: 0, kind: input, shape index: {}]   ;;  %s3958_s1 = inlined_call_operand.hbm [shape: f32[32,384], index: 1, kind: input, shape index: {}]   ;;  %s3959_s2 = inlined_call_operand.hbm [shape: f32[8,128], index: 2, kind: input, shape index: {}]   ;;  %s3960_s3 = inlined_call_operand.hbm [shape: f32[16,32], index: 3, kind: output, shape index: {}]  }
   0x1   :  { %9 = vsyncpa [#allocation6], 0 }
   0x2   :  { %10 = vsyncpa [#allocation4], 0  ;;  %s3472_s12 = smov [#allocation5]   ;;  %s3378_s16 = scalar_lea.hbm %s3958_s1, 1536 }
   0x3   :  { %s28_s13 = sshll.u32 %s3472_s12, 4  ;;  %p3379_p0 = scmp.ne.s32.totalorder %s3958_s1, %s3378_s16  ;;  %s29_s13 = int_to_ptr.vmem [resolvable:$true] %s28_s13 }
   0x4   :  { %p3382_p1 = scmp.lt.u32.totalorder %s3378_s16, %s3958_s1 }
   0x6   :  { %p3384_p2 = pnand %p3382_p1, %p3379_p0 }
   0x8   :  { %3387 = shalt.err (!%p3384_p2)
}
   0x9   :  { %s3388_s21 = scalar_lea.vmem %s29_s13, 1536  ;;  %p3393_p4 = scmp.lt.s32.totalorder %s29_s13, %s29_s13 }
   0xa   :  { %p3389_p3 = scmp.ne.s32.totalorder %s29_s13, %s3388_s21  ;;  %p3394_p5 = scmp.lt.s32.totalorder %s3388_s21, %s3388_s21 }
   0xc   :  { %p3395_p6 = por %p3394_p5, %p3393_p4 }
   0xe   :  { %p3396_p7 = pnand %p3395_p6, %p3389_p3 }
  0x10   :  { %3399 = shalt.err (!%p3396_p7)
}
  0x11   :  { %s3473_s22 = smov 384   ;;  %s3474_s23 = smov 24  }
  0x12   :  { %34 = dma.hbm_to_vmem [thread:$0]  %s3958_s1, 1536, %s29_s13, [#allocation6], %s3473_s22, %s3473_s22, %s3474_s23  }
  0x13   :  { %s3475_s26 = smov [#allocation2]   ;;  %s3400_s30 = scalar_lea.hbm %s3957_s0, 256 }
  0x14   :  { %s16_s27 = sshll.u32 %s3475_s26, 4  ;;  %p3401_p8 = scmp.ne.s32.totalorder %s3957_s0, %s3400_s30  ;;  %s17_s27 = int_to_ptr.vmem [resolvable:$true] %s16_s27 }
  0x15   :  { %p3404_p9 = scmp.lt.u32.totalorder %s3400_s30, %s3957_s0 }
  0x17   :  { %p3406_p10 = pnand %p3404_p9, %p3401_p8 }
  0x19   :  { %3409 = shalt.err (!%p3406_p10)
}
  0x1a   :  { %s3410_s8 = scalar_lea.vmem %s17_s27, 256  ;;  %p3415_p12 = scmp.lt.s32.totalorder %s17_s27, %s17_s27 }
  0x1b   :  { %p3411_p11 = scmp.ne.s32.totalorder %s17_s27, %s3410_s8  ;;  %p3416_p13 = scmp.lt.s32.totalorder %s3410_s8, %s3410_s8 }
  0x1d   :  { %p3417_p0 = por %p3416_p13, %p3415_p12 }
  0x1f   :  { %p3418_p1 = pnand %p3417_p0, %p3411_p11 }
  0x21   :  { %3421 = shalt.err (!%p3418_p1)
}
  0x22   :  { %s3476_s1 = smov 128   ;;  %s3477_s9 = smov 8  }
  0x23   :  { %22 = dma.hbm_to_vmem [thread:$0]  %s3957_s0, 256, %s17_s27, [#allocation3], %s3476_s1, %s3476_s1, %s3477_s9  }
  0x24   :  { %s3478_s12 = smov [#allocation7]   ;;  %s3422_s16 = scalar_lea.hbm %s3959_s2, 128 }
  0x25   :  { %s41_s13 = sshll.u32 %s3478_s12, 4  ;;  %p3423_p2 = scmp.ne.s32.totalorder %s3959_s2, %s3422_s16  ;;  %s42_s13 = int_to_ptr.vmem [resolvable:$true] %s41_s13 }
  0x26   :  { %p3426_p3 = scmp.lt.u32.totalorder %s3422_s16, %s3959_s2 }
  0x28   :  { %p3428_p4 = pnand %p3426_p3, %p3423_p2 }
  0x2a   :  { %3431 = shalt.err (!%p3428_p4)
}
  0x2b   :  { %s3432_s21 = scalar_lea.vmem %s42_s13, 128  ;;  %p3437_p6 = scmp.lt.s32.totalorder %s42_s13, %s42_s13 }
  0x2c   :  { %p3433_p5 = scmp.ne.s32.totalorder %s42_s13, %s3432_s21  ;;  %p3438_p7 = scmp.lt.s32.totalorder %s3432_s21, %s3432_s21 }
  0x2e   :  { %p3439_p8 = por %p3438_p7, %p3437_p6 }
  0x30   :  { %p3440_p9 = pnand %p3439_p8, %p3433_p5 }
  0x32   :  { %3443 = shalt.err (!%p3440_p9)
}
  0x33   :  { %44 = dma.hbm_to_vmem [thread:$0]  %s3959_s2, 128, %s42_s13, [#allocation6]  }
  0x34   :  { %3466 = dma.done.wait [#allocation3], 256  }
  0x35   :  { %3467 = vsyncadd [#allocation3], 4294967040 }
  0x36   :  { %3468 = dma.done.wait [#allocation6], 1664  }
  0x37   :  { %3469 = vsyncadd [#allocation6], 4294965632  ;;  %vm63_vm0 = vcmask 261120   ;;  %v54_v0 = vld [vmem:[#allocation2] sm:$0xff]  ;;  %v55_v1 = vld [vmem:[#allocation2 + $0x8] sm:$0xff]  ;;  %s3479_s2 = smov 112   ;;  %v213_v47 = vlaneseq }
  0x38   :  { %v64_v2 = vsel %vm63_vm0, %v54_v0, 0.0  ;;  %v67_v3 = vsel %vm63_vm0, %v55_v1, 0.0  ;;  %v103_v14 = vld [vmem:[#allocation5] sm:$0xff]  ;;  %v104_v15 = vld [vmem:[#allocation5 + $0x18] sm:$0xff]  ;;  %v105_v16 = vld [vmem:[#allocation5 + $0x30] sm:$0xff]  ;;  %s3480_s24 = smov 120  }
  0x39   :  { %65 = vadd.xlane.f32.xlu0 %v64_v2  ;;  %v3271_v17 = vpack.c.bf16 %v104_v15, %v103_v14  ;;  %v106_v18 = vld [vmem:[#allocation5 + $0x48] sm:$0xff]  ;;  %v3038_v27 = vld [vmem:[#allocation7] ss:$0 sm:$0xff]  ;;  %v3039_v29 = vld [vmem:[#allocation7 + $0x1] ss:$0 sm:$0xff]  ;;  %s3481_s25 = smov 104  }
  0x3a   :  { %v3275_v19 = vpack.c.bf16 %v106_v18, %v105_v16  ;;  %s3482_s26 = smov 96   ;;  %v3483_v43 = vmov 0.0   ;;  %vm3484_vm1 = vmmov 0   ;;  %v3485_v45 = vmov 1983009808   ;;  %s3487_s27 = smov 64  }
  0x3b   :  { %3272 = vmatprep.subr.bf16.mxu1 %v3271_v17  ;;  %3168 = vmatprep.subr.mxu0 %v3483_v43  ;;  %v211_v46 = vunpack.c.l.s4 %v3485_v45  ;;  %v214_v49 = vshrl.u32 %v213_v47, 7  ;;  %v3486_v50 = vmov 1934713408   ;;  %vm1072_vm2 = vcmask 64512   ;;  %s3488_s28 = smov 32   ;;  %s3489_s29 = smov 16  }
  0x3c   :  { %3274 = vmatpush3.bf16.msra.mxu1 %v3271_v17  ;;  %3170 = vmatprep.mubr.msk.f32.mxu0 %vm3484_vm1, %v3483_v43  ;;  %v243_v51 = vunpack.c.l.s4 %v3486_v50  ;;  %vm2683_vm3 = vcmask 130048   ;;  %vm2686_vm4 = vcmask 195584  }
  0x3d   :  { %68 = vadd.xlane.f32.xlu0 %v67_v3  ;;  %3276 = vmatprep.subr.bf16.mxu1 %v3275_v19  ;;  %v212_v48 = vunpack.c.0.s8 %v211_v46 }
  0x3e   :  { %v244_v57 = vunpack.c.0.s8 %v243_v51 }
  0x3f   :  { %v3597_v54 = vsub.s32 %v212_v48, %v214_v49 }
  0x40   :  { %3278 = vmatpush3.bf16.msra.mxu1 %v3275_v19  ;;  %v3607_v62 = vsub.s32 %v244_v57, %v214_v49 }
  0x41   :  { %3158 = vmatprep.subr.mxu1 %v3483_v43 }
  0xc6   :  { %v66_v4 = vpop.xlane.xlu0 %65 }
  0xc7   :  { %v71_v5 = vmul.f32 0.03125, %v66_v4 }
  0xc9   :  { %v73_v6 = vsub.f32 %v54_v0, %v71_v5 }
  0xca   :  { %v69_v7 = vpop.xlane.xlu0 %68 }
  0xcb   :  { %v72_v8 = vmul.f32 0.03125, %v69_v7  ;;  %v75_v9 = vmul.f32 %v73_v6, %v73_v6 }
  0xcd   :  { %v74_v10 = vsub.f32 %v55_v1, %v72_v8  ;;  %v77_v11 = vsel %vm63_vm0, %v75_v9, 0.0 }
  0xce   :  { %78 = vadd.xlane.f32.xlu1 %v77_v11 }
  0xcf   :  { %v76_v12 = vmul.f32 %v74_v10, %v74_v10 }
  0xd1   :  { %v80_v13 = vsel %vm63_vm0, %v76_v12, 0.0 }
  0xd2   :  { %81 = vadd.xlane.f32.xlu1 %v80_v13 }
 0x15b   :  { %v79_v20 = vpop.xlane.xlu1 %78 }
 0x15c   :  { %v83_v21 = vmul.f32 0.03125, %v79_v20 }
 0x15e   :  { %v85_v22 = vadd.f32 1e-05, %v83_v21 }
 0x15f   :  { %v82_v23 = vpop.xlane.xlu1 %81 }
 0x160   :  { %3332 = vrsqrt.f32 %v85_v22  ;;  %v84_v24 = vmul.f32 0.03125, %v82_v23 }
 0x162   :  { %v86_v25 = vadd.f32 1e-05, %v84_v24 }
 0x164   :  { %3334 = vrsqrt.f32 %v86_v25 }
 0x16a   :  { %v3333_v26 = vpop.eup %3332 }
 0x16b   :  { %v89_v28 = vmul.f32 %v3333_v26, %v73_v6 }
 0x16d   :  { %v95_v30 = vmul.f32 %v3038_v27, %v89_v28 }
 0x16e   :  { %v3335_v31 = vpop.eup %3334 }
 0x16f   :  { %v90_v32 = vmul.f32 %v3335_v31, %v74_v10  ;;  %v101_v33 = vadd.f32 %v3039_v29, %v95_v30 }
 0x171   :  { %v96_v34 = vmul.f32 %v3038_v27, %v90_v32  ;;  %3155 = vmatprep.mubr.msk.f32.mxu1 %vm63_vm0, %v101_v33 }
 0x173   :  { %v102_v35 = vadd.f32 %v3039_v29, %v96_v34 }
 0x175   :  { %3156 = vmatmul.mubr.msk.f32.vlgmr.msra.gmra.mrb[0].mxu1 %vm63_vm0, %v102_v35 }
 0x176   :  { %3160 = vmatprep.mubr.msk.f32.mxu1 %vm3484_vm1, %v3483_v43 }
 0x248   :  { %v3557_v36 = vpop.f32.mrb[0].mxu1 }
 0x249   :  { %v3559_v37 = vpop.f32.mrb[1].mxu1 }
 0x24a   :  { %196 = vrot.lane.b32.xlu1 %v3559_v37, %s3479_s2  ;;  %190 = vrot.lane.b32.xlu0 %v3559_v37, %s3480_s24 }
 0x24e   :  { %202 = vrot.lane.b32.xlu1 %v3559_v37, %s3481_s25  ;;  %198 = vrot.lane.b32.xlu0 %v3557_v36, %s3479_s2 }
 0x252   :  { %192 = vrot.lane.b32.xlu1 %v3557_v36, %s3480_s24  ;;  %480 = vrot.lane.b32.xlu0 %v3559_v37, %s3482_s26 }
 0x256   :  { %204 = vrot.lane.b32.xlu1 %v3557_v36, %s3481_s25 }
 0x2bc   :  { %v3568_v38 = vpop.permute.xlu1 %196  ;;  %v3570_v39 = vpop.permute.xlu0 %190 }
 0x2bd   :  { %488 = vrot.lane.b32.xlu0 %v3568_v38, %s3482_s26  ;;  %484 = vrot.lane.b32.xlu1 %v3570_v39, %s3482_s26  ;;  %v208_v55 = vcombine.low %v3559_v37, %v3568_v38  ;;  %v209_v56 = vcombine.high %v3559_v37, %v3568_v38 }
 0x2bf   :  { %v216_v60 = vrot.slane %v208_v55, %v3597_v54  ;;  %v223_v61 = vrot.slane %v209_v56, %v3597_v54 }
 0x2c0   :  { %v3574_v40 = vpop.permute.xlu1 %202  ;;  %v3578_v41 = vpop.permute.xlu0 %198 }
 0x2c1   :  { %482 = vrot.lane.b32.xlu0 %v3557_v36, %s3482_s26  ;;  %492 = vrot.lane.b32.xlu1 %v3574_v40, %s3482_s26  ;;  %v224_v52 = vcombine.low %v3570_v39, %v3574_v40  ;;  %v225_v53 = vcombine.high %v3570_v39, %v3574_v40  ;;  %v276_v9 = vcombine.low %v3557_v36, %v3578_v41 }
 0x2c2   :  { %v277_v15 = vcombine.high %v3557_v36, %v3578_v41 }
 0x2c3   :  { %v232_v58 = vrot.slane %v224_v52, %v3597_v54  ;;  %v239_v59 = vrot.slane %v225_v53, %v3597_v54  ;;  %v284_v18 = vrot.slane %v276_v9, %v3597_v54 }
 0x2c4   :  { %v3580_v42 = vpop.permute.xlu1 %192  ;;  %v481_v10 = vpop.permute.xlu0 %480  ;;  %v291_v25 = vrot.slane %v277_v15, %v3597_v54 }
 0x2c5   :  { %490 = vrot.lane.b32.xlu0 %v3578_v41, %s3482_s26  ;;  %486 = vrot.lane.b32.xlu1 %v3580_v42, %s3482_s26  ;;  %v240_v63 = vcombine.low %v216_v60, %v232_v58  ;;  %v241_v0 = vcombine.high %v216_v60, %v232_v58  ;;  %v256_v1 = vcombine.low %v223_v61, %v239_v59 }
 0x2c6   :  { %v257_v2 = vcombine.high %v223_v61, %v239_v59 }
 0x2c7   :  { %v248_v3 = vrot.slane %v240_v63, %v3607_v62  ;;  %v255_v4 = vrot.slane %v241_v0, %v3607_v62  ;;  %v264_v5 = vrot.slane %v256_v1, %v3607_v62 }
 0x2c8   :  { %v3585_v44 = vpop.permute.xlu1 %204  ;;  %v271_v6 = vrot.slane %v257_v2, %v3607_v62 }
 0x2c9   :  { %494 = vrot.lane.b32.xlu1 %v3585_v44, %s3482_s26  ;;  %v292_v7 = vcombine.low %v3580_v42, %v3585_v44  ;;  %v344_v8 = vcombine.low %v248_v3, %v255_v4  ;;  %v3042_v11 = vcombine.high %v248_v3, %v255_v4  ;;  %v293_v14 = vcombine.high %v3580_v42, %v3585_v44 }
 0x2ca   :  { %v360_v12 = vcombine.low %v264_v5, %v271_v6  ;;  %v3043_v13 = vcombine.high %v264_v5, %v271_v6 }
 0x2cb   :  { %v300_v16 = vrot.slane %v292_v7, %v3597_v54  ;;  %v351_v17 = vrot.slane %v344_v8, %v3597_v54  ;;  %v359_v21 = vrot.slane %v3042_v11, %v3597_v54  ;;  %v307_v24 = vrot.slane %v293_v14, %v3597_v54 }
 0x2cc   :  { %v367_v22 = vrot.slane %v360_v12, %v3597_v54  ;;  %v375_v23 = vrot.slane %v3043_v13, %v3597_v54 }
 0x2cd   :  { %v308_v26 = vcombine.low %v284_v18, %v300_v16  ;;  %v309_v27 = vcombine.high %v284_v18, %v300_v16  ;;  %v324_v31 = vcombine.low %v291_v25, %v307_v24  ;;  %v325_v32 = vcombine.high %v291_v25, %v307_v24 }
 0x2ce   :  { %v376_v34 = vcombine.low %v351_v17, %v359_v21  ;;  %v392_v35 = vcombine.low %v367_v22, %v375_v23  ;;  %v377_v49 = vcombine.high %v351_v17, %v359_v21  ;;  %v393_v50 = vcombine.high %v367_v22, %v375_v23 }
 0x2cf   :  { %v316_v47 = vrot.slane %v308_v26, %v3607_v62  ;;  %v323_v48 = vrot.slane %v309_v27, %v3607_v62  ;;  %v332_v56 = vrot.slane %v324_v31, %v3607_v62  ;;  %v339_v57 = vrot.slane %v325_v32, %v3607_v62 }
 0x2d0   :  { %v3638_v59 = vrot.slane %v376_v34, %v3607_v62  ;;  %v3641_v60 = vrot.slane %v392_v35, %v3607_v62  ;;  %v3644_v5 = vrot.slane %v377_v49, %v3607_v62  ;;  %v3647_v6 = vrot.slane %v393_v50, %v3607_v62 }
 0x2d1   :  { %v412_v3 = vcombine.low %v316_v47, %v323_v48  ;;  %v3044_v4 = vcombine.high %v316_v47, %v323_v48  ;;  %v428_v11 = vcombine.low %v332_v56, %v339_v57  ;;  %v3045_v12 = vcombine.high %v332_v56, %v339_v57 }
 0x2d3   :  { %v3657_v21 = vrot.slane %v3044_v4, %v3597_v54 }
 0x32f   :  { %v485_v19 = vpop.permute.xlu1 %484  ;;  %v489_v20 = vpop.permute.xlu0 %488 }
 0x330   :  { %v504_v28 = vcombine.low %v481_v10, %v489_v20  ;;  %v505_v29 = vcombine.high %v481_v10, %v489_v20  ;;  %v3654_v20 = vrot.slane %v412_v3, %v3597_v54 }
 0x332   :  { %v512_v51 = vrot.slane %v504_v28, %v3597_v54  ;;  %v519_v52 = vrot.slane %v505_v29, %v3597_v54 }
 0x333   :  { %v483_v30 = vpop.permute.xlu0 %482  ;;  %v493_v33 = vpop.permute.xlu1 %492 }
 0x334   :  { %v520_v45 = vcombine.low %v485_v19, %v493_v33  ;;  %v521_v46 = vcombine.high %v485_v19, %v493_v33 }
 0x336   :  { %v528_v53 = vrot.slane %v520_v45, %v3597_v54  ;;  %v535_v55 = vrot.slane %v521_v46, %v3597_v54 }
 0x337   :  { %v487_v58 = vpop.permute.xlu1 %486  ;;  %v491_v2 = vpop.permute.xlu0 %490 }
 0x338   :  { %v536_v61 = vcombine.low %v512_v51, %v528_v53  ;;  %v537_v63 = vcombine.high %v512_v51, %v528_v53  ;;  %v552_v0 = vcombine.low %v519_v52, %v535_v55  ;;  %v553_v1 = vcombine.high %v519_v52, %v535_v55 }
 0x339   :  { %v572_v13 = vcombine.low %v483_v30, %v491_v2  ;;  %v573_v14 = vcombine.high %v483_v30, %v491_v2 }
 0x33a   :  { %v544_v7 = vrot.slane %v536_v61, %v3607_v62  ;;  %v551_v8 = vrot.slane %v537_v63, %v3607_v62  ;;  %v560_v9 = vrot.slane %v552_v0, %v3607_v62  ;;  %v567_v10 = vrot.slane %v553_v1, %v3607_v62 }
 0x33b   :  { %v495_v15 = vpop.permute.xlu1 %494  ;;  %v580_v28 = vrot.slane %v572_v13, %v3597_v54  ;;  %v587_v29 = vrot.slane %v573_v14, %v3597_v54  ;;  %v443_v61 = vrot.slane %v3045_v12, %v3597_v54  ;;  %v410_v12 = vcombine.low %v3644_v5, %v3647_v6 }
 0x33c   :  { %v640_v16 = vcombine.low %v544_v7, %v551_v8  ;;  %v3046_v17 = vcombine.high %v544_v7, %v551_v8  ;;  %v656_v18 = vcombine.low %v560_v9, %v567_v10  ;;  %v3047_v19 = vcombine.high %v560_v9, %v567_v10 }
 0x33d   :  { %v588_v22 = vcombine.low %v487_v58, %v495_v15  ;;  %v589_v23 = vcombine.high %v487_v58, %v495_v15  ;;  %v435_v58 = vrot.slane %v428_v11, %v3597_v54  ;;  %v408_v7 = vcombine.low %v3638_v59, %v3641_v60 }
 0x33e   :  { %v647_v24 = vrot.slane %v640_v16, %v3597_v54  ;;  %v655_v25 = vrot.slane %v3046_v17, %v3597_v54  ;;  %v663_v26 = vrot.slane %v656_v18, %v3597_v54  ;;  %v671_v27 = vrot.slane %v3047_v19, %v3597_v54 }
 0x33f   :  { %v596_v30 = vrot.slane %v588_v22, %v3597_v54  ;;  %v603_v31 = vrot.slane %v589_v23, %v3597_v54  ;;  %v444_v14 = vcombine.low %v3654_v20, %v3657_v21  ;;  %v460_v15 = vcombine.low %v435_v58, %v443_v61 }
 0x340   :  { %v672_v32 = vcombine.low %v647_v24, %v655_v25  ;;  %v688_v33 = vcombine.low %v663_v26, %v671_v27  ;;  %v673_v34 = vcombine.high %v647_v24, %v655_v25  ;;  %v689_v35 = vcombine.high %v663_v26, %v671_v27 }
 0x341   :  { %v604_v45 = vcombine.low %v580_v28, %v596_v30  ;;  %v605_v46 = vcombine.high %v580_v28, %v596_v30  ;;  %v620_v47 = vcombine.low %v587_v29, %v603_v31  ;;  %v621_v48 = vcombine.high %v587_v29, %v603_v31 }
 0x342   :  { %v680_v49 = vrot.slane %v672_v32, %v3607_v62  ;;  %v696_v50 = vrot.slane %v688_v33, %v3607_v62  ;;  %v687_v51 = vrot.slane %v673_v34, %v3607_v62  ;;  %v703_v52 = vrot.slane %v689_v35, %v3607_v62 }
 0x343   :  { %v612_v53 = vrot.slane %v604_v45, %v3607_v62  ;;  %v619_v55 = vrot.slane %v605_v46, %v3607_v62  ;;  %v628_v56 = vrot.slane %v620_v47, %v3607_v62  ;;  %v635_v57 = vrot.slane %v621_v48, %v3607_v62 }
 0x344   :  { %v704_v63 = vcombine.low %v680_v49, %v696_v50  ;;  %v706_v0 = vcombine.low %v687_v51, %v703_v52  ;;  %v705_v13 = vcombine.high %v680_v49, %v696_v50  ;;  %v409_v22 = vcombine.high %v3638_v59, %v3641_v60 }
 0x345   :  { %v708_v1 = vcombine.low %v612_v53, %v619_v55  ;;  %v3048_v2 = vcombine.high %v612_v53, %v619_v55  ;;  %v724_v3 = vcombine.low %v628_v56, %v635_v57  ;;  %v3049_v4 = vcombine.high %v628_v56, %v635_v57 }
 0x346   :  { %3159 = vmatpush3.xpose.msk.msra.mxu1 %vm1072_vm2, %v704_v63  ;;  %3169 = vmatpush3.xpose.msk.msra.mxu0 %vm1072_vm2, %v706_v0  ;;  %v445_v25 = vcombine.high %v3654_v20, %v3657_v21  ;;  %v707_v26 = vcombine.high %v687_v51, %v703_v52  ;;  %v452_v27 = vrot.slane %v444_v14, %v3607_v62 }
 0x347   :  { %v715_v8 = vrot.slane %v708_v1, %v3597_v54  ;;  %v723_v9 = vrot.slane %v3048_v2, %v3597_v54  ;;  %v731_v10 = vrot.slane %v724_v3, %v3597_v54  ;;  %v739_v11 = vrot.slane %v3049_v4, %v3597_v54  ;;  %3163 = vmatprep.subr.mxu1 %v3483_v43 }
 0x348   :  { %3178 = vmatprep.subr.mxu0 %v3483_v43  ;;  %v468_v59 = vrot.slane %v460_v15, %v3607_v62  ;;  %v461_v60 = vcombine.high %v435_v58, %v443_v61  ;;  %v411_v20 = vcombine.high %v3644_v5, %v3647_v6  ;;  %v459_v32 = vrot.slane %v445_v25, %v3607_v62 }
 0x349   :  { %v740_v16 = vcombine.low %v715_v8, %v723_v9  ;;  %v741_v17 = vcombine.high %v715_v8, %v723_v9  ;;  %v756_v18 = vcombine.low %v731_v10, %v739_v11  ;;  %v757_v19 = vcombine.high %v731_v10, %v739_v11  ;;  %3161 = vmatmul.mubr.msk.f32.vlgmr.msra.gmra.mrb[2].mxu1 %vm1072_vm2, %v408_v7 }
 0x34a   :  { %3171 = vmatmul.mubr.msk.f32.vlgmr.msra.gmra.mrb[0].mxu0 %vm1072_vm2, %v410_v12  ;;  %3164 = vmatpush3.xpose.msk.msra.mxu1 %vm1072_vm2, %v705_v13  ;;  %v476_v21 = vcombine.low %v452_v27, %v468_v59  ;;  %v475_v33 = vrot.slane %v461_v60, %v3607_v62  ;;  %v477_v5 = vcombine.high %v452_v27, %v468_v59 }
 0x34b   :  { %3165 = vmatprep.mubr.msk.f32.mxu1 %vm3484_vm1, %v3483_v43  ;;  %3173 = vmatprep.subr.mxu1 %v3483_v43  ;;  %v748_v23 = vrot.slane %v740_v16, %v3607_v62  ;;  %v764_v24 = vrot.slane %v756_v18, %v3607_v62  ;;  %v755_v29 = vrot.slane %v741_v17, %v3607_v62 }
 0x34c   :  { %3180 = vmatprep.mubr.msk.f32.mxu0 %vm3484_vm1, %v3483_v43  ;;  %v771_v30 = vrot.slane %v757_v19, %v3607_v62  ;;  %v478_v6 = vcombine.low %v459_v32, %v475_v33  ;;  %v479_v45 = vcombine.high %v459_v32, %v475_v33 }
 0x34d   :  { %3166 = vmatmul.mubr.msk.f32.vlgmr.msra.gmra.mrb[4].mxu1 %vm1072_vm2, %v409_v22  ;;  %v772_v28 = vcombine.low %v748_v23, %v764_v24  ;;  %v773_v31 = vcombine.high %v748_v23, %v764_v24 }
 0x34e   :  { %3174 = vmatpush3.xpose.msk.msra.mxu1 %vm1072_vm2, %v707_v26  ;;  %3175 = vmatprep.mubr.msk.f32.mxu1 %vm3484_vm1, %v3483_v43  ;;  %v774_v34 = vcombine.low %v755_v29, %v771_v30  ;;  %v775_v35 = vcombine.high %v755_v29, %v771_v30 }
 0x34f   :  { %3179 = vmatpush3.xpose.msk.msra.mxu0 %vm1072_vm2, %v772_v28  ;;  %3183 = vmatprep.subr.mxu1 %v3483_v43 }
 0x350   :  { %3188 = vmatprep.subr.mxu0 %v3483_v43 }
 0x351   :  { %3176 = vmatmul.mubr.msk.f32.vlgmr.msra.gmra.mrb[6].mxu1 %vm1072_vm2, %v411_v20 }
 0x352   :  { %3181 = vmatmul.mubr.msk.f32.vlgmr.msra.gmra.mrb[2].mxu0 %vm1072_vm2, %v476_v21  ;;  %3184 = vmatpush3.xpose.msk.msra.mxu1 %vm1072_vm2, %v773_v31 }
 0x353   :  { %3189 = vmatpush3.xpose.msk.msra.mxu0 %vm1072_vm2, %v774_v34  ;;  %3185 = vmatprep.mubr.msk.f32.mxu1 %vm3484_vm1, %v3483_v43 }
 0x354   :  { %3190 = vmatprep.mubr.msk.f32.mxu0 %vm3484_vm1, %v3483_v43  ;;  %3193 = vmatprep.subr.mxu1 %v3483_v43 }
 0x355   :  { %3186 = vmatmul.mubr.msk.f32.vlgmr.msra.gmra.mrb[8].mxu1 %vm1072_vm2, %v477_v5  ;;  %3198 = vmatprep.subr.mxu0 %v3483_v43 }
 0x356   :  { %3191 = vmatmul.mubr.msk.f32.vlgmr.msra.gmra.mrb[4].mxu0 %vm1072_vm2, %v478_v6  ;;  %3194 = vmatpush3.xpose.msk.msra.mxu1 %vm1072_vm2, %v775_v35 }
 0x357   :  { %3195 = vmatprep.mubr.msk.f32.mxu1 %vm3484_vm1, %v3483_v43  ;;  %3203 = vmatprep.subr.mxu1 %v3483_v43 }
 0x358   :  { %3200 = vmatprep.mubr.msk.f32.mxu0 %vm3484_vm1, %v3483_v43 }
 0x359   :  { %3196 = vmatmul.mubr.msk.f32.vlgmr.msra.gmra.mrb[10].mxu1 %vm1072_vm2, %v479_v45 }
 0x35a   :  { %3205 = vmatprep.mubr.msk.f32.mxu1 %vm3484_vm1, %v3483_v43 }
 0x41c   :  { %v1145_v46 = vpop.f32.mrb[2].mxu1 }
 0x41d   :  { %v1681_v47 = vmul.f32 0.35355338, %v1145_v46  ;;  %v1297_v48 = vpop.f32.mrb[0].mxu0  ;;  %v3162_v49 = vpop.f32.mrb[3].mxu1 }
 0x41e   :  { %v3172_v50 = vpop.f32.mrb[1].mxu0  ;;  %v1683_v51 = vmul.f32 0.35355338, %v1297_v48 }
 0x41f   :  { %v1689_v52 = vsel %vm1072_vm2, %v1681_v47, -inf }
 0x420   :  { %1690 = vmax.xlane.f32.xlu0 %v1689_v52  ;;  %v1221_v53 = vpop.f32.mrb[4].mxu1  ;;  %v1695_v57 = vsel %vm1072_vm2, %v1683_v51, -inf }
 0x421   :  { %v1682_v55 = vmul.f32 0.35355338, %v1221_v53  ;;  %v3167_v56 = vpop.f32.mrb[5].mxu1 }
 0x423   :  { %v1692_v58 = vsel %vm1072_vm2, %v1682_v55, -inf }
 0x424   :  { %1696 = vmax.xlane.f32.xlu0 %v1695_v57  ;;  %1693 = vmax.xlane.f32.xlu1 %v1692_v58  ;;  %v1373_v61 = vpop.f32.mrb[6].mxu1 }
 0x425   :  { %v1684_v63 = vmul.f32 0.35355338, %v1373_v61  ;;  %v1449_v0 = vpop.f32.mrb[2].mxu0  ;;  %v3177_v1 = vpop.f32.mrb[7].mxu1 }
 0x426   :  { %v3182_v2 = vpop.f32.mrb[3].mxu0  ;;  %v1685_v3 = vmul.f32 0.35355338, %v1449_v0 }
 0x427   :  { %v1698_v4 = vsel %vm1072_vm2, %v1684_v63, -inf }
 0x428   :  { %1699 = vmax.xlane.f32.xlu0 %v1698_v4  ;;  %v1525_v7 = vpop.f32.mrb[8].mxu1  ;;  %v1701_v12 = vsel %vm1072_vm2, %v1685_v3, -inf }
 0x429   :  { %v1601_v8 = vpop.f32.mrb[4].mxu0  ;;  %v3187_v9 = vpop.f32.mrb[9].mxu1  ;;  %v3757_v16 = vmul.f32 0.35355338, %v1525_v7 }
 0x42a   :  { %v3192_v10 = vpop.f32.mrb[5].mxu0  ;;  %v1687_v11 = vmul.f32 0.35355338, %v1601_v8 }
 0x42b   :  { %v1704_v18 = vsel %vm1072_vm2, %v3757_v16, -inf }
 0x42c   :  { %v1677_v13 = vpop.f32.mrb[10].mxu1  ;;  %1702 = vmax.xlane.f32.xlu0 %v1701_v12  ;;  %v1707_v15 = vsel %vm1072_vm2, %v1687_v11, -inf }
 0x42d   :  { %v3197_v14 = vpop.f32.mrb[11].mxu1  ;;  %v3759_v17 = vmul.f32 0.35355338, %v1677_v13 }
 0x430   :  { %1708 = vmax.xlane.f32.xlu0 %v1707_v15 }
 0x435   :  { %780 = vrot.lane.b32.xlu1 %v3570_v39, %s3487_s27 }
 0x439   :  { %784 = vrot.lane.b32.xlu1 %v3568_v38, %s3487_s27  ;;  %v1710_v38 = vsel %vm1072_vm2, %v3759_v17, -inf }
 0x43d   :  { %788 = vrot.lane.b32.xlu1 %v3574_v40, %s3487_s27 }
 0x446   :  { %776 = vrot.lane.b32.xlu0 %v3559_v37, %s3487_s27 }
 0x44a   :  { %778 = vrot.lane.b32.xlu0 %v3557_v36, %s3487_s27 }
 0x461   :  { %1705 = vmax.xlane.f32.xlu1 %v1704_v18 }
 0x465   :  { %1711 = vmax.xlane.f32.xlu1 %v1710_v38 }
 0x476   :  { %782 = vrot.lane.b32.xlu1 %v3580_v42, %s3487_s27 }
 0x4ad   :  { %v1691_v39 = vpop.xlane.xlu0 %1690 }
 0x4ae   :  { %v1713_v37 = vsub.f32 %v1681_v47, %v1691_v39 }
 0x4b0   :  { %v1721_v40 = vmul.f32 1.442695, %v1713_v37 }
 0x4b1   :  { %v1694_v19 = vpop.xlane.xlu1 %1693  ;;  %v1697_v36 = vpop.xlane.xlu0 %1696 }
 0x4b2   :  { %3336 = vpow2.f32 %v1721_v40  ;;  %v1714_v22 = vsub.f32 %v1682_v55, %v1694_v19  ;;  %v1715_v23 = vsub.f32 %v1683_v51, %v1697_v36 }
 0x4b4   :  { %v1723_v24 = vmul.f32 1.442695, %v1714_v22  ;;  %v1725_v25 = vmul.f32 1.442695, %v1715_v23 }
 0x4b5   :  { %v781_v26 = vpop.permute.xlu1 %780  ;;  %v1700_v27 = vpop.xlane.xlu0 %1699 }
 0x4b6   :  { %3338 = vpow2.f32 %v1723_v24  ;;  %v1716_v59 = vsub.f32 %v1684_v63, %v1700_v27 }
 0x4b7   :  { %3340 = vpow2.f32 %v1725_v25 }
 0x4b8   :  { %v1727_v60 = vmul.f32 1.442695, %v1716_v59 }
 0x4b9   :  { %v785_v28 = vpop.permute.xlu1 %784  ;;  %v1703_v29 = vpop.xlane.xlu0 %1702 }
 0x4ba   :  { %3342 = vpow2.f32 %v1727_v60  ;;  %v1717_v42 = vsub.f32 %v1685_v3, %v1703_v29 }
 0x4bc   :  { %v3767_v30 = vpop.eup %3336  ;;  %v1729_v20 = vmul.f32 1.442695, %v1717_v42 }
 0x4bd   :  { %v789_v21 = vpop.permute.xlu1 %788  ;;  %v1709_v31 = vpop.xlane.xlu0 %1708  ;;  %v1737_v32 = vsel %vm1072_vm2, %v3767_v30, 0.0 }
 0x4be   :  { %3344 = vpow2.f32 %v1729_v20  ;;  %v1719_v33 = vsub.f32 %v1687_v11, %v1709_v31  ;;  %1738 = vadd.xlane.f32.xlu0 %v1737_v32  ;;  %v816_v5 = vcombine.low %v781_v26, %v789_v21  ;;  %v817_v6 = vcombine.high %v781_v26, %v789_v21 }
 0x4c0   :  { %v3771_v34 = vpop.eup %3338  ;;  %v1733_v35 = vmul.f32 1.442695, %v1719_v33  ;;  %v824_v52 = vrot.slane %v816_v5, %v3597_v54  ;;  %v831_v53 = vrot.slane %v817_v6, %v3597_v54 }
 0x4c1   :  { %v3773_v45 = vpop.eup %3340  ;;  %v777_v46 = vpop.permute.xlu0 %776  ;;  %v1740_v47 = vsel %vm1072_vm2, %v3771_v34, 0.0 }
 0x4c2   :  { %3346 = vpow2.f32 %v1733_v35  ;;  %v800_v48 = vcombine.low %v777_v46, %v785_v28  ;;  %v801_v49 = vcombine.high %v777_v46, %v785_v28  ;;  %1741 = vadd.xlane.f32.xlu1 %v1740_v47  ;;  %v1743_v50 = vsel %vm1072_vm2, %v3773_v45, 0.0 }
 0x4c3   :  { %1744 = vadd.xlane.f32.xlu0 %v1743_v50 }
 0x4c4   :  { %v3779_v51 = vpop.eup %3342  ;;  %v808_v55 = vrot.slane %v800_v48, %v3597_v54  ;;  %v815_v56 = vrot.slane %v801_v49, %v3597_v54 }
 0x4c5   :  { %v1746_v57 = vsel %vm1072_vm2, %v3779_v51, 0.0 }
 0x4c6   :  { %v832_v58 = vcombine.low %v808_v55, %v824_v52  ;;  %v833_v61 = vcombine.high %v808_v55, %v824_v52  ;;  %v848_v63 = vcombine.low %v815_v56, %v831_v53  ;;  %v849_v0 = vcombine.high %v815_v56, %v831_v53  ;;  %1747 = vadd.xlane.f32.xlu1 %v1746_v57 }
 0x4c8   :  { %v3787_v1 = vpop.eup %3344  ;;  %v840_v2 = vrot.slane %v832_v58, %v3607_v62  ;;  %v847_v3 = vrot.slane %v833_v61, %v3607_v62  ;;  %v856_v4 = vrot.slane %v848_v63, %v3607_v62  ;;  %v863_v7 = vrot.slane %v849_v0, %v3607_v62 }
 0x4c9   :  { %v1749_v8 = vsel %vm1072_vm2, %v3787_v1, 0.0 }
 0x4ca   :  { %v936_v9 = vcombine.low %v840_v2, %v847_v3  ;;  %v3050_v10 = vcombine.high %v840_v2, %v847_v3  ;;  %v952_v11 = vcombine.low %v856_v4, %v863_v7  ;;  %v3051_v12 = vcombine.high %v856_v4, %v863_v7  ;;  %1750 = vadd.xlane.f32.xlu0 %v1749_v8 }
 0x4cc   :  { %v3795_v13 = vpop.eup %3346  ;;  %v943_v14 = vrot.slane %v936_v9, %v3597_v54  ;;  %v951_v15 = vrot.slane %v3050_v10, %v3597_v54  ;;  %v959_v18 = vrot.slane %v952_v11, %v3597_v54  ;;  %v967_v38 = vrot.slane %v3051_v12, %v3597_v54 }
 0x4cd   :  { %v1755_v39 = vsel %vm1072_vm2, %v3795_v13, 0.0 }
 0x4ce   :  { %1756 = vadd.xlane.f32.xlu0 %v1755_v39  ;;  %v968_v37 = vcombine.low %v943_v14, %v951_v15  ;;  %v984_v40 = vcombine.low %v959_v18, %v967_v38  ;;  %v969_v19 = vcombine.high %v943_v14, %v951_v15  ;;  %v985_v36 = vcombine.high %v959_v18, %v967_v38 }
 0x4d0   :  { %v976_v22 = vrot.slane %v968_v37, %v3607_v62  ;;  %v992_v23 = vrot.slane %v984_v40, %v3607_v62  ;;  %v983_v24 = vrot.slane %v969_v19, %v3607_v62  ;;  %v999_v25 = vrot.slane %v985_v36, %v3607_v62 }
 0x4d2   :  { %v1000_v26 = vcombine.low %v976_v22, %v992_v23  ;;  %v1001_v27 = vcombine.high %v976_v22, %v992_v23  ;;  %v1002_v59 = vcombine.low %v983_v24, %v999_v25  ;;  %v1003_v60 = vcombine.high %v983_v24, %v999_v25 }
 0x4d4   :  { %3199 = vmatpush3.msra.mxu0 %v1000_v26  ;;  %3204 = vmatpush3.msra.mxu1 %v1001_v27 }
 0x4d5   :  { %3208 = vmatprep.subr.mxu0 %v3483_v43  ;;  %3213 = vmatprep.subr.mxu1 %v3483_v43 }
 0x4e4   :  { %786 = vrot.lane.b32.xlu0 %v3578_v41, %s3487_s27 }
 0x4ee   :  { %v1706_v28 = vpop.xlane.xlu1 %1705 }
 0x4ef   :  { %v1718_v29 = vsub.f32 %v3757_v16, %v1706_v28  ;;  %v779_v16 = vpop.permute.xlu0 %778 }
 0x4f1   :  { %v1731_v42 = vmul.f32 1.442695, %v1718_v29 }
 0x4f2   :  { %v1712_v20 = vpop.xlane.xlu1 %1711 }
 0x4f3   :  { %3348 = vpow2.f32 %v1731_v42  ;;  %v1720_v21 = vsub.f32 %v3759_v17, %v1712_v20 }
 0x4f5   :  { %v1735_v31 = vmul.f32 1.442695, %v1720_v21 }
 0x4f6   :  { %v783_v6 = vpop.permute.xlu1 %782 }
 0x4f7   :  { %3350 = vpow2.f32 %v1735_v31 }
 0x4fd   :  { %v3813_v32 = vpop.eup %3348 }
 0x4fe   :  { %v1752_v33 = vsel %vm1072_vm2, %v3813_v32, 0.0 }
 0x4ff   :  { %1753 = vadd.xlane.f32.xlu1 %v1752_v33 }
 0x501   :  { %v3817_v5 = vpop.eup %3350 }
 0x502   :  { %v1758_v41 = vsel %vm1072_vm2, %v3817_v5, 0.0 }
 0x503   :  { %1759 = vadd.xlane.f32.xlu1 %v1758_v41 }
 0x514   :  { %790 = vrot.lane.b32.xlu1 %v3585_v44, %s3487_s27 }
 0x54b   :  { %v1739_v17 = vpop.xlane.xlu0 %1738 }
 0x54c   :  { %3352 = vrcp.f32 %v1739_v17 }
 0x54f   :  { %v1742_v35 = vpop.xlane.xlu1 %1741 }
 0x550   :  { %3354 = vrcp.f32 %v1742_v35  ;;  %v1745_v46 = vpop.xlane.xlu0 %1744 }
 0x551   :  { %3356 = vrcp.f32 %v1745_v46 }
 0x553   :  { %v1748_v47 = vpop.xlane.xlu1 %1747 }
 0x554   :  { %3358 = vrcp.f32 %v1748_v47 }
 0x556   :  { %v3353_v48 = vpop.eup %3352 }
 0x557   :  { %v1769_v49 = vmul.f32 %v3353_v48, %v1739_v17 }
 0x559   :  { %v1777_v50 = vsub.f32 2.0, %v1769_v49 }
 0x55a   :  { %v3355_v52 = vpop.eup %3354 }
 0x55b   :  { %v3357_v53 = vpop.eup %3356  ;;  %v1785_v55 = vmul.f32 %v3353_v48, %v1777_v50  ;;  %v1770_v56 = vmul.f32 %v3355_v52, %v1742_v35 }
 0x55c   :  { %v1771_v57 = vmul.f32 %v3357_v53, %v1745_v46 }
 0x55d   :  { %v1793_v44 = vmul.f32 %v3767_v30, %v1785_v55  ;;  %v1778_v58 = vsub.f32 2.0, %v1770_v56 }
 0x55e   :  { %v3359_v61 = vpop.eup %3358  ;;  %v1779_v63 = vsub.f32 2.0, %v1771_v57 }
 0x55f   :  { %v1786_v0 = vmul.f32 %v3355_v52, %v1778_v58  ;;  %v1772_v2 = vmul.f32 %v3359_v61, %v1748_v47  ;;  %3201 = vmatmul.mubr.msk.f32.vlgmr.msra.gmra.mrb[6].mxu0 %vm1072_vm2, %v1793_v44 }
 0x560   :  { %v1787_v3 = vmul.f32 %v3357_v53, %v1779_v63  ;;  %3209 = vmatpush3.msra.mxu0 %v1002_v59  ;;  %3210 = vmatprep.mubr.msk.f32.mxu0 %vm3484_vm1, %v3483_v43 }
 0x561   :  { %v1794_v4 = vmul.f32 %v3771_v34, %v1786_v0  ;;  %v1780_v7 = vsub.f32 2.0, %v1772_v2  ;;  %3218 = vmatprep.subr.mxu0 %v3483_v43  ;;  %v1751_v34 = vpop.xlane.xlu0 %1750 }
 0x562   :  { %v1795_v8 = vmul.f32 %v3773_v45, %v1787_v3  ;;  %3360 = vrcp.f32 %v1751_v34 }
 0x563   :  { %v1788_v30 = vmul.f32 %v3359_v61, %v1780_v7  ;;  %3206 = vmatmul.mubr.msk.f32.vlgmr.msra.gmra.mrb[12].mxu1 %vm1072_vm2, %v1794_v4 }
 0x564   :  { %3211 = vmatmul.mubr.msk.f32.vlgmr.msra.gmra.mrb[8].mxu0 %vm1072_vm2, %v1795_v8  ;;  %3214 = vmatpush3.msra.mxu1 %v1003_v60 }
 0x565   :  { %v1796_v9 = vmul.f32 %v3779_v51, %v1788_v30  ;;  %3215 = vmatprep.mubr.msk.f32.mxu1 %vm3484_vm1, %v3483_v43  ;;  %3223 = vmatprep.subr.mxu1 %v3483_v43  ;;  %v1757_v45 = vpop.xlane.xlu0 %1756 }
 0x566   :  { %3220 = vmatprep.mubr.msk.f32.mxu0 %vm3484_vm1, %v3483_v43 }
 0x567   :  { %3216 = vmatmul.mubr.msk.f32.vlgmr.msra.gmra.mrb[14].mxu1 %vm1072_vm2, %v1796_v9 }
 0x568   :  { %3225 = vmatprep.mubr.msk.f32.mxu1 %vm3484_vm1, %v3483_v43 }
 0x569   :  { %v787_v51 = vpop.permute.xlu0 %786 }
 0x56a   :  { %v868_v12 = vcombine.low %v779_v16, %v787_v51  ;;  %v869_v14 = vcombine.high %v779_v16, %v787_v51 }
 0x56c   :  { %v3361_v39 = vpop.eup %3360  ;;  %v876_v40 = vrot.slane %v868_v12, %v3597_v54  ;;  %v883_v19 = vrot.slane %v869_v14, %v3597_v54  ;;  %v2692_v14 = vld [vmem:[#allocation5 + $0x48] sm:$0xff] }
 0x56d   :  { %v1773_v59 = vmul.f32 %v3361_v39, %v1751_v34 }
 0x58c   :  { %v1754_v10 = vpop.xlane.xlu1 %1753 }
 0x58d   :  { %3362 = vrcp.f32 %v1754_v10 }
 0x58e   :  { %3364 = vrcp.f32 %v1757_v45 }
 0x590   :  { %v1760_v11 = vpop.xlane.xlu1 %1759 }
 0x591   :  { %3366 = vrcp.f32 %v1760_v11 }
 0x594   :  { %v791_v15 = vpop.permute.xlu1 %790 }
 0x595   :  { %v884_v18 = vcombine.low %v783_v6, %v791_v15  ;;  %v885_v38 = vcombine.high %v783_v6, %v791_v15  ;;  %v1781_v6 = vsub.f32 2.0, %v1773_v59 }
 0x597   :  { %v3363_v37 = vpop.eup %3362  ;;  %v892_v36 = vrot.slane %v884_v18, %v3597_v54  ;;  %v899_v22 = vrot.slane %v885_v38, %v3597_v54  ;;  %v1789_v57 = vmul.f32 %v3361_v39, %v1781_v6 }
 0x598   :  { %v3365_v27 = vpop.eup %3364  ;;  %v1774_v60 = vmul.f32 %v3363_v37, %v1754_v10 }
 0x599   :  { %v900_v23 = vcombine.low %v876_v40, %v892_v36  ;;  %v901_v24 = vcombine.high %v876_v40, %v892_v36  ;;  %v916_v25 = vcombine.low %v883_v19, %v899_v22  ;;  %v917_v26 = vcombine.high %v883_v19, %v899_v22 }
 0x59a   :  { %v1775_v17 = vmul.f32 %v3365_v27, %v1757_v45  ;;  %v1782_v35 = vsub.f32 2.0, %v1774_v60  ;;  %v1797_v8 = vmul.f32 %v3787_v1, %v1789_v57 }
 0x59b   :  { %v3367_v28 = vpop.eup %3366  ;;  %v908_v29 = vrot.slane %v900_v23, %v3607_v62  ;;  %v915_v42 = vrot.slane %v901_v24, %v3607_v62  ;;  %v924_v20 = vrot.slane %v916_v25, %v3607_v62  ;;  %v931_v21 = vrot.slane %v917_v26, %v3607_v62 }
 0x59c   :  { %v1776_v46 = vmul.f32 %v3367_v28, %v1760_v11  ;;  %v1783_v44 = vsub.f32 2.0, %v1775_v17  ;;  %v1790_v58 = vmul.f32 %v3363_v37, %v1782_v35  ;;  %v2690_v11 = vld [vmem:[#allocation5 + $0x18] sm:$0xff] }
 0x59d   :  { %v1004_v31 = vcombine.low %v908_v29, %v915_v42  ;;  %v3052_v33 = vcombine.high %v908_v29, %v915_v42  ;;  %v1020_v41 = vcombine.low %v924_v20, %v931_v21  ;;  %v3053_v16 = vcombine.high %v924_v20, %v931_v21 }
 0x59e   :  { %v1784_v61 = vsub.f32 2.0, %v1776_v46  ;;  %v1791_v30 = vmul.f32 %v3365_v27, %v1783_v44  ;;  %v1798_v9 = vmul.f32 %v3813_v32, %v1790_v58  ;;  %v2689_v32 = vld [vmem:[#allocation5] sm:$0xff] }
 0x59f   :  { %v1011_v47 = vrot.slane %v1004_v31, %v3597_v54  ;;  %v1019_v48 = vrot.slane %v3052_v33, %v3597_v54  ;;  %v1027_v49 = vrot.slane %v1020_v41, %v3597_v54  ;;  %v1035_v50 = vrot.slane %v3053_v16, %v3597_v54 }
 0x5a0   :  { %v1792_v34 = vmul.f32 %v3367_v28, %v1784_v61  ;;  %v1799_v51 = vmul.f32 %v3795_v13, %v1791_v30  ;;  %v3322_v12 = vpack.i.bf16 %v2690_v11, %v2689_v32  ;;  %v2691_v13 = vld [vmem:[#allocation5 + $0x30] sm:$0xff] }
 0x5a1   :  { %v1036_v52 = vcombine.low %v1011_v47, %v1019_v48  ;;  %v1052_v53 = vcombine.low %v1027_v49, %v1035_v50  ;;  %v1037_v55 = vcombine.high %v1011_v47, %v1019_v48  ;;  %v1053_v56 = vcombine.high %v1027_v49, %v1035_v50 }
 0x5a2   :  { %v1800_v1 = vmul.f32 %v3817_v5, %v1792_v34  ;;  %3323 = vrot.lane.b32.xlu0 %v3322_v12, %s3488_s28  ;;  %v3327_v5 = vpack.i.bf16 %v2692_v14, %v2691_v13 }
 0x5a3   :  { %v1044_v63 = vrot.slane %v1036_v52, %v3607_v62  ;;  %v1060_v0 = vrot.slane %v1052_v53, %v3607_v62  ;;  %v1051_v2 = vrot.slane %v1037_v55, %v3607_v62  ;;  %v1067_v3 = vrot.slane %v1053_v56, %v3607_v62 }
 0x5a4   :  { %3328 = vrot.lane.b32.xlu1 %v3327_v5, %s3488_s28 }
 0x5a5   :  { %v1068_v4 = vcombine.low %v1044_v63, %v1060_v0  ;;  %v1069_v7 = vcombine.high %v1044_v63, %v1060_v0  ;;  %v1070_v45 = vcombine.low %v1051_v2, %v1067_v3  ;;  %v1071_v10 = vcombine.high %v1051_v2, %v1067_v3 }
 0x5a7   :  { %3219 = vmatpush3.msra.mxu0 %v1068_v4  ;;  %3224 = vmatpush3.msra.mxu1 %v1069_v7 }
 0x5a8   :  { %3221 = vmatmul.mubr.msk.f32.vlgmr.msra.gmra.mrb[10].mxu0 %vm1072_vm2, %v1797_v8  ;;  %3226 = vmatmul.mubr.msk.f32.vlgmr.msra.gmra.mrb[16].mxu1 %vm1072_vm2, %v1798_v9 }
 0x5a9   :  { %3228 = vmatprep.subr.mxu0 %v3483_v43  ;;  %3233 = vmatprep.subr.mxu1 %v3483_v43 }
 0x5aa   :  { %3229 = vmatpush3.msra.mxu0 %v1070_v45  ;;  %3234 = vmatpush3.msra.mxu1 %v1071_v10 }
 0x5ab   :  { %3230 = vmatprep.mubr.msk.f32.mxu0 %vm3484_vm1, %v3483_v43  ;;  %3235 = vmatprep.mubr.msk.f32.mxu1 %vm3484_vm1, %v3483_v43 }
 0x5ac   :  { %3231 = vmatmul.mubr.msk.f32.vlgmr.msra.gmra.mrb[12].mxu0 %vm1072_vm2, %v1799_v51  ;;  %3236 = vmatmul.mubr.msk.f32.vlgmr.msra.gmra.mrb[18].mxu1 %vm1072_vm2, %v1800_v1 }
 0x614   :  { %v3324_v39 = vpop.permute.xlu0 %3323 }
 0x615   :  { %v3326_v43 = vunpack.i.h.bf16 %v3324_v39  ;;  %v3325_v19 = vunpack.i.l.bf16 %v3324_v39 }
 0x616   :  { %v3329_v45 = vpop.permute.xlu1 %3328 }
 0x617   :  { %v3279_v24 = vpack.c.bf16 %v3326_v43, %v3325_v19  ;;  %v3331_v10 = vunpack.i.h.bf16 %v3329_v45  ;;  %v3330_v51 = vunpack.i.l.bf16 %v3329_v45 }
 0x619   :  { %3280 = vmatprep.subr.bf16.mxu0 %v3279_v24 }
 0x61a   :  { %3282 = vmatpush3.bf16.msra.mxu0 %v3279_v24 }
 0x632   :  { %v1870_v15 = vpop.f32.mrb[6].mxu0 }
 0x633   :  { %v3202_v18 = vpop.f32.mrb[7].mxu0 }
 0x634   :  { %v3283_v18 = vpack.c.bf16 %v3331_v10, %v3330_v51 }
 0x636   :  { %v1943_v38 = vpop.f32.mrb[12].mxu1  ;;  %3284 = vmatprep.subr.bf16.mxu0 %v3283_v18 }
 0x637   :  { %v2016_v37 = vpop.f32.mrb[8].mxu0  ;;  %v3207_v40 = vpop.f32.mrb[13].mxu1  ;;  %3286 = vmatpush3.bf16.msra.mxu0 %v3283_v18 }
 0x638   :  { %v2385_v36 = vcombine.low %v1870_v15, %v2016_v37  ;;  %v2386_v22 = vcombine.high %v1870_v15, %v2016_v37  ;;  %v3212_v23 = vpop.f32.mrb[9].mxu0 }
 0x63a   :  { %v2089_v25 = vpop.f32.mrb[14].mxu1  ;;  %v2393_v60 = vrot.slane %v2385_v36, %v3597_v54  ;;  %v2400_v28 = vrot.slane %v2386_v22, %v3597_v54 }
 0x63b   :  { %v2401_v26 = vcombine.low %v1943_v38, %v2089_v25  ;;  %v2402_v27 = vcombine.high %v1943_v38, %v2089_v25  ;;  %v3217_v59 = vpop.f32.mrb[15].mxu1 }
 0x63d   :  { %v2409_v29 = vrot.slane %v2401_v26, %v3597_v54  ;;  %v2416_v42 = vrot.slane %v2402_v27, %v3597_v54 }
 0x63f   :  { %v2417_v20 = vcombine.low %v2393_v60, %v2409_v29  ;;  %v2418_v21 = vcombine.high %v2393_v60, %v2409_v29  ;;  %v2433_v31 = vcombine.low %v2400_v28, %v2416_v42  ;;  %v2434_v33 = vcombine.high %v2400_v28, %v2416_v42 }
 0x641   :  { %v2425_v41 = vrot.slane %v2417_v20, %v3607_v62  ;;  %v2432_v16 = vrot.slane %v2418_v21, %v3607_v62  ;;  %v2441_v6 = vrot.slane %v2433_v31, %v3607_v62  ;;  %v2448_v17 = vrot.slane %v2434_v33, %v3607_v62 }
 0x643   :  { %v2521_v35 = vcombine.low %v2425_v41, %v2432_v16  ;;  %v3078_v46 = vcombine.high %v2425_v41, %v2432_v16  ;;  %v2537_v47 = vcombine.low %v2441_v6, %v2448_v17  ;;  %v3079_v48 = vcombine.high %v2441_v6, %v2448_v17 }
 0x645   :  { %v2528_v49 = vrot.slane %v2521_v35, %v3597_v54  ;;  %v2536_v50 = vrot.slane %v3078_v46, %v3597_v54  ;;  %v2544_v52 = vrot.slane %v2537_v47, %v3597_v54  ;;  %v2552_v53 = vrot.slane %v3079_v48, %v3597_v54 }
 0x647   :  { %v2553_v55 = vcombine.low %v2528_v49, %v2536_v50  ;;  %v2569_v56 = vcombine.low %v2544_v52, %v2552_v53  ;;  %v2554_v57 = vcombine.high %v2528_v49, %v2536_v50  ;;  %v2570_v44 = vcombine.high %v2544_v52, %v2552_v53 }
 0x649   :  { %v3884_v58 = vrot.slane %v2553_v55, %v3607_v62  ;;  %v3887_v61 = vrot.slane %v2569_v56, %v3607_v62  ;;  %v2568_v63 = vrot.slane %v2554_v57, %v3607_v62  ;;  %v2584_v0 = vrot.slane %v2570_v44, %v3607_v62 }
 0x64b   :  { %v2586_v2 = vcombine.high %v3884_v58, %v3887_v61  ;;  %v2585_v3 = vcombine.low %v3884_v58, %v3887_v61  ;;  %v2587_v4 = vcombine.low %v2568_v63, %v2584_v0  ;;  %v2588_v7 = vcombine.high %v2568_v63, %v2584_v0 }
 0x64d   :  { %2659 = vrot.lane.b32.xlu0 %v2586_v2, %s3477_s9 }
 0x651   :  { %2667 = vrot.lane.b32.xlu0 %v2587_v4, %s3489_s29 }
 0x655   :  { %2675 = vrot.lane.b32.xlu0 %v2588_v7, %s3474_s23  ;;  %v3082_v7 = vld [vmem:[#allocation7 + $0x2] ss:$0 sm:$0xff] }
 0x67b   :  { %v2162_v8 = vpop.f32.mrb[10].mxu0  ;;  %v2235_v30 = vpop.f32.mrb[16].mxu1 }
 0x67c   :  { %v3222_v9 = vpop.f32.mrb[11].mxu0  ;;  %v3227_v34 = vpop.f32.mrb[17].mxu1 }
 0x67d   :  { %v3377_v34 = vld [vmem:[#allocation2] sm:$0xff] }
 0x67f   :  { %v2308_v1 = vpop.f32.mrb[12].mxu0  ;;  %v2381_v32 = vpop.f32.mrb[18].mxu1 }
 0x680   :  { %v2453_v11 = vcombine.low %v2162_v8, %v2308_v1  ;;  %v2454_v12 = vcombine.high %v2162_v8, %v2308_v1  ;;  %v2469_v13 = vcombine.low %v2235_v30, %v2381_v32  ;;  %v2470_v14 = vcombine.high %v2235_v30, %v2381_v32  ;;  %v3232_v5 = vpop.f32.mrb[13].mxu0  ;;  %v3237_v15 = vpop.f32.mrb[19].mxu1 }
 0x682   :  { %v2461_v38 = vrot.slane %v2453_v11, %v3597_v54  ;;  %v2468_v39 = vrot.slane %v2454_v12, %v3597_v54  ;;  %v2477_v37 = vrot.slane %v2469_v13, %v3597_v54  ;;  %v2484_v40 = vrot.slane %v2470_v14, %v3597_v54 }
 0x684   :  { %v2485_v43 = vcombine.low %v2461_v38, %v2477_v37  ;;  %v2486_v19 = vcombine.high %v2461_v38, %v2477_v37  ;;  %v2501_v36 = vcombine.low %v2468_v39, %v2484_v40  ;;  %v2502_v22 = vcombine.high %v2468_v39, %v2484_v40  ;;  %v2834_v39 = vld [vmem:[#allocation5 + $0x8] sm:$0xff]  ;;  %v2835_v37 = vld [vmem:[#allocation5 + $0x20] sm:$0xff] }
 0x685   :  { %v3287_v40 = vpack.c.bf16 %v2835_v37, %v2834_v39 }
 0x686   :  { %v2493_v23 = vrot.slane %v2485_v43, %v3607_v62  ;;  %v2500_v24 = vrot.slane %v2486_v19, %v3607_v62  ;;  %v2509_v25 = vrot.slane %v2501_v36, %v3607_v62  ;;  %v2516_v26 = vrot.slane %v2502_v22, %v3607_v62  ;;  %v2836_v43 = vld [vmem:[#allocation5 + $0x38] sm:$0xff]  ;;  %v2837_v19 = vld [vmem:[#allocation5 + $0x50] sm:$0xff] }
 0x687   :  { %3288 = vmatprep.subr.bf16.mxu1 %v3287_v40  ;;  %v3291_v36 = vpack.c.bf16 %v2837_v19, %v2836_v43 }
 0x688   :  { %v2589_v27 = vcombine.low %v2493_v23, %v2500_v24  ;;  %v3080_v59 = vcombine.high %v2493_v23, %v2500_v24  ;;  %v2605_v60 = vcombine.low %v2509_v25, %v2516_v26  ;;  %v3081_v28 = vcombine.high %v2509_v25, %v2516_v26  ;;  %3290 = vmatpush3.bf16.msra.mxu1 %v3287_v40 }
 0x689   :  { %3292 = vmatprep.subr.bf16.mxu1 %v3291_v36 }
 0x68a   :  { %v2596_v29 = vrot.slane %v2589_v27, %v3597_v54  ;;  %v2604_v42 = vrot.slane %v3080_v59, %v3597_v54  ;;  %v2612_v20 = vrot.slane %v2605_v60, %v3597_v54  ;;  %v2620_v21 = vrot.slane %v3081_v28, %v3597_v54  ;;  %v3085_v60 = vld [vmem:[#allocation7 + $0x3] ss:$0 sm:$0xff] }
 0x68c   :  { %v2621_v31 = vcombine.low %v2596_v29, %v2604_v42  ;;  %v2637_v33 = vcombine.low %v2612_v20, %v2620_v21  ;;  %v2622_v41 = vcombine.high %v2596_v29, %v2604_v42  ;;  %v2638_v16 = vcombine.high %v2612_v20, %v2620_v21  ;;  %3294 = vmatpush3.bf16.msra.mxu1 %v3291_v36  ;;  %v3086_v29 = vld [vmem:[#allocation7 + $0x4] ss:$0 sm:$0xff] }
 0x68e   :  { %v2629_v6 = vrot.slane %v2621_v31, %v3607_v62  ;;  %v2645_v17 = vrot.slane %v2637_v33, %v3607_v62  ;;  %v2636_v35 = vrot.slane %v2622_v41, %v3607_v62  ;;  %v2652_v46 = vrot.slane %v2638_v16, %v3607_v62  ;;  %v2933_v16 = vld [vmem:[#allocation5 + $0x10] sm:$0xff] }
 0x690   :  { %v2654_v47 = vcombine.high %v2629_v6, %v2645_v17  ;;  %v2653_v48 = vcombine.low %v2629_v6, %v2645_v17  ;;  %v2655_v49 = vcombine.low %v2636_v35, %v2652_v46  ;;  %v2656_v50 = vcombine.high %v2636_v35, %v2652_v46  ;;  %v2934_v6 = vld [vmem:[#allocation5 + $0x28] sm:$0xff]  ;;  %v2935_v35 = vld [vmem:[#allocation5 + $0x40] sm:$0xff]  ;;  %v2936_v46 = vld [vmem:[#allocation5 + $0x58] sm:$0xff] }
 0x691   :  { %v3295_v17 = vpack.c.bf16 %v2934_v6, %v2933_v16 }
 0x692   :  { %2661 = vrot.lane.b32.xlu1 %v2654_v47, %s3477_s9  ;;  %v3299_v47 = vpack.c.bf16 %v2936_v46, %v2935_v35 }
 0x693   :  { %3296 = vmatprep.subr.bf16.mxu0 %v3295_v17 }
 0x696   :  { %2669 = vrot.lane.b32.xlu1 %v2655_v49, %s3489_s29 }
 0x69a   :  { %2677 = vrot.lane.b32.xlu1 %v2656_v50, %s3474_s23  ;;  %s3490_s23 = smov [#allocation8]  }
 0x69b   :  { %s3025_s30 = sshll.u32 %s3490_s23, 4  ;;  %s3026_s30 = int_to_ptr.vmem [resolvable:$true] %s3025_s30 }
 0x69c   :  { %s3444_s4 = scalar_lea.vmem %s3026_s30, 256  ;;  %p3449_p11 = scmp.lt.s32.totalorder %s3026_s30, %s3026_s30 }
 0x69d   :  { %p3445_p10 = scmp.ne.s32.totalorder %s3026_s30, %s3444_s4  ;;  %p3450_p12 = scmp.lt.s32.totalorder %s3444_s4, %s3444_s4 }
 0x69f   :  { %p3451_p13 = por %p3450_p12, %p3449_p11 }
 0x6a1   :  { %p3452_p0 = pnand %p3451_p13, %p3445_p10 }
 0x6bf   :  { %v2660_v54 = vpop.permute.xlu0 %2659 }
 0x6c0   :  { %v2681_v53 = vsel %vm1072_vm2, %v2585_v3, %v2660_v54  ;;  %v3376_v3 = vld [vmem:[#allocation2 + $0x8] sm:$0xff] }
 0x6c3   :  { %v2668_v52 = vpop.permute.xlu0 %2667 }
 0x6c4   :  { %v2684_v62 = vsel %vm2683_vm3, %v2681_v53, %v2668_v52 }
 0x6c7   :  { %v2676_v55 = vpop.permute.xlu0 %2675 }
 0x6c8   :  { %v2687_v56 = vsel %vm2686_vm4, %v2684_v62, %v2676_v55 }
 0x6c9   :  { %3246 = vmatprep.mubr.msk.f32.mxu0 %vm63_vm0, %v2687_v56 }
 0x704   :  { %v2662_v57 = vpop.permute.xlu1 %2661 }
 0x705   :  { %v2682_v63 = vsel %vm1072_vm2, %v2653_v48, %v2662_v57  ;;  %v3087_v48 = vld [vmem:[#allocation7 + $0x6] ss:$0 sm:$0xff] }
 0x708   :  { %v2670_v44 = vpop.permute.xlu1 %2669 }
 0x709   :  { %v2685_v0 = vsel %vm2683_vm3, %v2682_v63, %v2670_v44 }
 0x70c   :  { %v2678_v2 = vpop.permute.xlu1 %2677 }
 0x70d   :  { %v2688_v4 = vsel %vm2686_vm4, %v2685_v0, %v2678_v2 }
 0x70e   :  { %3247 = vmatmul.mubr.msk.f32.vlgmr.msra.gmra.mrb[14].mxu0 %vm63_vm0, %v2688_v4 }
 0x70f   :  { %3298 = vmatpush3.bf16.xpose.msra.mxu0 %v3295_v17 }
 0x710   :  { %3300 = vmatprep.subr.bf16.mxu0 %v3299_v47 }
 0x717   :  { %3302 = vmatpush3.bf16.xpose.msra.mxu0 %v3299_v47 }
 0x7e1   :  { %v3248_v8 = vpop.f32.mrb[14].mxu0 }
 0x7e2   :  { %v2791_v30 = vadd.f32 %v3248_v8, %v3082_v7  ;;  %v2785_v58 = vpop.f32.mrb[15].mxu0 }
 0x7e3   :  { %v2786_v61 = vadd.f32 %v3082_v7, %v2785_v58  ;;  %v3090_v7 = vld [vmem:[#allocation7 + $0x5] ss:$0 sm:$0xff] }
 0x7e4   :  { %v3924_v9 = vadd.f32 %v3376_v3, %v2791_v30 }
 0x7e5   :  { %v3926_v45 = vadd.f32 %v3377_v34, %v2786_v61 }
 0x7e6   :  { %v2799_v10 = vsel %vm63_vm0, %v3924_v9, 0.0 }
 0x7e7   :  { %2800 = vadd.xlane.f32.xlu1 %v2799_v10  ;;  %v2796_v51 = vsel %vm63_vm0, %v3926_v45, 0.0 }
 0x7e8   :  { %2797 = vadd.xlane.f32.xlu0 %v2796_v51 }
 0x874   :  { %v2801_v1 = vpop.xlane.xlu1 %2800 }
 0x875   :  { %v2803_v32 = vmul.f32 0.03125, %v2801_v1  ;;  %v2798_v11 = vpop.xlane.xlu0 %2797 }
 0x876   :  { %v2802_v12 = vmul.f32 0.03125, %v2798_v11 }
 0x877   :  { %v2805_v13 = vsub.f32 %v3924_v9, %v2803_v32 }
 0x878   :  { %v2804_v14 = vsub.f32 %v3926_v45, %v2802_v12 }
 0x879   :  { %v2807_v18 = vmul.f32 %v2805_v13, %v2805_v13 }
 0x87a   :  { %v2806_v5 = vmul.f32 %v2804_v14, %v2804_v14 }
 0x87b   :  { %v2811_v38 = vsel %vm63_vm0, %v2807_v18, 0.0 }
 0x87c   :  { %v2808_v15 = vsel %vm63_vm0, %v2806_v5, 0.0 }
 0x87d   :  { %2809 = vadd.xlane.f32.xlu0 %v2808_v15 }
 0x881   :  { %2812 = vadd.xlane.f32.xlu0 %v2811_v38 }
 0x90a   :  { %v2810_v22 = vpop.xlane.xlu0 %2809 }
 0x90b   :  { %v2814_v23 = vmul.f32 0.03125, %v2810_v22 }
 0x90d   :  { %v2816_v24 = vadd.f32 1e-05, %v2814_v23 }
 0x90e   :  { %v2813_v25 = vpop.xlane.xlu0 %2812 }
 0x90f   :  { %3368 = vrsqrt.f32 %v2816_v24  ;;  %v2815_v26 = vmul.f32 0.03125, %v2813_v25 }
 0x911   :  { %v2817_v27 = vadd.f32 1e-05, %v2815_v26 }
 0x913   :  { %3370 = vrsqrt.f32 %v2817_v27 }
 0x919   :  { %v3369_v59 = vpop.eup %3368 }
 0x91a   :  { %v2820_v28 = vmul.f32 %v3369_v59, %v2804_v14 }
 0x91c   :  { %v2826_v42 = vmul.f32 %v3085_v60, %v2820_v28 }
 0x91d   :  { %v3371_v20 = vpop.eup %3370 }
 0x91e   :  { %v2821_v21 = vmul.f32 %v3371_v20, %v2805_v13  ;;  %v2832_v31 = vadd.f32 %v3086_v29, %v2826_v42 }
 0x920   :  { %v2827_v33 = vmul.f32 %v3085_v60, %v2821_v21  ;;  %3257 = vmatprep.mubr.msk.f32.mxu1 %vm63_vm0, %v2832_v31 }
 0x922   :  { %v2833_v41 = vadd.f32 %v3086_v29, %v2827_v33 }
 0x924   :  { %3258 = vmatmul.mubr.msk.f32.vlgmr.msra.gmra.mrb[20].mxu1 %vm63_vm0, %v2833_v41 }
 0x9f7   :  { %v3259_v49 = vpop.f32.mrb[20].mxu1 }
 0x9f8   :  { %v2920_v50 = vadd.f32 %v3259_v49, %v3087_v48  ;;  %v2914_v54 = vpop.f32.mrb[21].mxu1 }
 0x9f9   :  { %v2915_v52 = vadd.f32 %v3087_v48, %v2914_v54 }
 0x9fa   :  { %v2926_v53 = vmul.f32 0.70710677, %v2920_v50  ;;  %v2924_v0 = vmul.f32 0.5, %v2920_v50 }
 0x9fb   :  { %v2925_v62 = vmul.f32 0.70710677, %v2915_v52  ;;  %v2923_v44 = vmul.f32 0.5, %v2915_v52 }
 0x9fc   :  { %3372 = verf.f32 %v2926_v53 }
 0x9fd   :  { %3374 = verf.f32 %v2925_v62 }
 0xa06   :  { %v3373_v55 = vpop.eup %3372 }
 0xa07   :  { %v3375_v56 = vpop.eup %3374  ;;  %v2930_v57 = vadd.f32 1.0, %v3373_v55 }
 0xa08   :  { %v2929_v63 = vadd.f32 1.0, %v3375_v56 }
 0xa09   :  { %v2932_v4 = vmul.f32 %v2930_v57, %v2924_v0 }
 0xa0a   :  { %v2931_v2 = vmul.f32 %v2929_v63, %v2923_v44 }
 0xa0c   :  { %3268 = vmatprep.mubr.f32.mxu0 %v2931_v2 }
 0xa0d   :  { %3269 = vmatmul.mubr.f32.vlgmr.msra.gmra.mrb[16].mxu0 %v2932_v4 }
 0xae0   :  { %v3270_v8 = vpop.f32.mrb[16].mxu0 }
 0xae1   :  { %v3013_v30 = vadd.f32 %v3270_v8, %v3090_v7  ;;  %v3007_v58 = vpop.f32.mrb[17].mxu0 }
 0xae2   :  { %v3008_v61 = vadd.f32 %v3090_v7, %v3007_v58 }
 0xae3   :  { %v3017_v3 = vadd.f32 %v3013_v30, %v3924_v9 }
 0xae4   :  { %v3016_v34 = vadd.f32 %v3008_v61, %v3926_v45 }
 0xae5   :  { %3019 = vst.msk [vmem:[#allocation8 + $0x8] sm:$0xff] %vm63_vm0, %v3017_v3 }
 0xae6   :  { %3018 = vst.msk [vmem:[#allocation8] sm:$0xff] %vm63_vm0, %v3016_v34 }
 0xae7   :  { %3455 = shalt.err (!%p3452_p0)
}
 0xae8   :  { %s3456_s7 = scalar_lea.hbm %s3960_s3, 256 }
 0xae9   :  { %p3457_p1 = scmp.ne.s32.totalorder %s3960_s3, %s3456_s7  ;;  %p3460_p2 = scmp.lt.u32.totalorder %s3456_s7, %s3960_s3 }
 0xaeb   :  { %p3462_p3 = pnand %p3460_p2, %p3457_p1 }
 0xaed   :  { %3465 = shalt.err (!%p3462_p3)
}
 0xaee   :  { %3031 = dma.vmem_to_hbm [thread:$0]  %s3026_s30, 256, %s3960_s3, [#allocation4], %s3476_s1, %s3476_s1, %s3477_s9  }
 0xaef   :  { %3470 = dma.done.wait [#allocation4], 256  }
 0xaf0   :  { %3471 = vsyncadd [#allocation4], 4294967040 }
 0xaf1   :  { %3035 = vsyncpa [#allocation3], 1 }
 0xaf2   :  { %3036 = vsyncpa [#allocation6], 1 }
 0xaf3   :  { %3037 = vsyncpa [#allocation4], 1 }

</bundles_post_ra>
